<compile_context>
chip_gen: v7x
topology: tpu7x:2x2x1
jax: 0.10.0
libtpu: 0.0.40
codegen_flags: <defaults>
</compile_context>

<pallas_src>
import jax
import jax.numpy as jnp
from jax.experimental import pallas as pl
from jax.experimental.pallas import tpu as pltpu


def _round_up(n, m):
    return ((n + m - 1) // m) * m


def _vmem_capacity_bytes():
    """Physical VMEM per core, generation-aware with a safe (v7x-sized) fallback."""
    try:
        cap = int(getattr(pltpu.get_tpu_info(), "vmem_capacity_bytes", 0))
        if cap > 0:
            return cap
    except Exception:
        pass
    return 64 << 20


def _vmem_estimate(tb, inc, hidden):
    """Upper-bound VMEM footprint (bytes) for a batch tile of tb rows."""
    bf16, f32 = 2, 4
    return (
        2 * tb * inc * bf16                              # double-buffered x tiles (bf16)
        + 2 * tb * 1 * f32                               # double-buffered (tb, 1) out tiles
        + 2 * (inc * hidden + hidden * hidden) * bf16    # double-buffered bf16 W1/W2 (resident)
        + 2 * 3 * hidden * f32                           # double-buffered b1/b2/w3 row (f32)
        + 2 * tb * hidden * f32                          # h1, h2 activations (f32)
        + tb * hidden * bf16                             # bf16 copy of h1 for fc2
        + (2 << 20)                                      # slack for compiler-internal scratch
    )


def _pick_batch_tile(B, inc, hidden, block_b, vmem_budget):
    """Batch tile: multiple of 128, as large as block_b / the VMEM budget allow."""
    tb = _round_up(min(max(block_b, 128), _round_up(B, 128)), 128)
    while tb > 128 and _vmem_estimate(tb, inc, hidden) > vmem_budget:
        tb = _round_up(tb // 2, 128)
    # v7x has 2 TensorCores: keep >=2 "parallel" grid steps whenever the batch
    # can be split into two >=128-row tiles (no-op on v5e/v6e single-TC chips).
    if B > 128:
        tb = min(tb, _round_up(-(-B // 2), 128))
    return max(tb, 128)


def discriminator_kernel(x_ref, w1_ref, b1_ref, w2_ref, b2_ref, w3_ref, b3_ref,
                         out_ref):
    # fc1 + ReLU: bf16 operands on the MXU, f32 accumulation, f32 epilogue.
    x = x_ref[...]                                                   # (tb, inc) bf16
    h1 = jnp.dot(x, w1_ref[...], preferred_element_type=jnp.float32) + b1_ref[...]
    h1 = jnp.maximum(h1, 0.0)
    # fc2 + ReLU: cast the activation back to bf16 for the MXU.
    h2 = jnp.dot(h1.astype(jnp.bfloat16), w2_ref[...],
                 preferred_element_type=jnp.float32) + b2_ref[...]
    h2 = jnp.maximum(h2, 0.0)
    # fc3 (N == 1): VPU multiply + lane reduce against the (1, hidden) w3 row,
    # instead of a <1%-utilization MXU matmul.  Kept in f32.
    logits = jnp.sum(h2 * w3_ref[...], axis=-1, keepdims=True) + b3_ref[0]
    out_ref[...] = jax.nn.sigmoid(logits)


def discriminator_forward(x, params, reverse=True, eta=1.0, block_b=1024):
    """x: (B, inc) float32. Returns (B, 1) float32.

    `reverse`/`eta` only affect gradients (GradReverse is identity in forward),
    so they are no-ops here.
    """
    del reverse, eta
    w1, b1, w2, b2, w3, b3 = params
    B, inc = x.shape
    hidden = w1.shape[1]

    # Generation-aware VMEM budget (leave ~15% headroom for Mosaic scratch).
    vmem_budget = int(_vmem_capacity_bytes() * 0.85)
    tb = _pick_batch_tile(B, inc, hidden, block_b, vmem_budget)
    vmem_limit = int(min(max(_vmem_estimate(tb, inc, hidden), 16 << 20), vmem_budget))

    # Pad the batch to a tile multiple; cast MXU operands to bf16.
    padded_b = _round_up(B, tb)
    x_bf = x.astype(jnp.bfloat16)
    if padded_b != B:
        x_bf = jnp.pad(x_bf, ((0, padded_b - B), (0, 0)))
    grid = (padded_b // tb,)

    w1_bf = w1.astype(jnp.bfloat16)
    w2_bf = w2.astype(jnp.bfloat16)
    b1_f = b1.reshape(1, hidden).astype(jnp.float32)
    b2_f = b2.reshape(1, hidden).astype(jnp.float32)
    w3_row = w3.reshape(1, hidden).astype(jnp.float32)   # fc3 weight as a row (VPU path)
    b3_s = b3.reshape((1,)).astype(jnp.float32)          # fc3 bias as an SMEM scalar

    grid_spec = pltpu.PrefetchScalarGridSpec(
        num_scalar_prefetch=0,
        grid=grid,
        in_specs=[
            pl.BlockSpec((tb, inc), lambda i: (i, 0)),          # x tile (bf16)
            pl.BlockSpec((inc, hidden), lambda i: (0, 0)),      # W1 (bf16, resident)
            pl.BlockSpec((1, hidden), lambda i: (0, 0)),        # b1 (f32, resident)
            pl.BlockSpec((hidden, hidden), lambda i: (0, 0)),   # W2 (bf16, resident)
            pl.BlockSpec((1, hidden), lambda i: (0, 0)),        # b2 (f32, resident)
            pl.BlockSpec((1, hidden), lambda i: (0, 0)),        # W3 row (f32, resident)
            pl.BlockSpec(memory_space=pltpu.MemorySpace.SMEM),  # b3 scalar
        ],
        out_specs=pl.BlockSpec((tb, 1), lambda i: (i, 0)),
    )

    out = pl.pallas_call(
        discriminator_kernel,
        out_shape=jax.ShapeDtypeStruct((padded_b, 1), jnp.float32),
        grid_spec=grid_spec,
        compiler_params=pltpu.CompilerParams(
            dimension_semantics=("parallel",),
            vmem_limit_bytes=vmem_limit,
        ),
    )(x_bf, w1_bf, b1_f, w2_bf, b2_f, w3_row, b3_s)

    return out[:B]


def init_params(key, inc, hidden=512):
    """Deterministic torch.nn.Linear-style init: U(-1/sqrt(fan_in), 1/sqrt(fan_in))."""
    ks = jax.random.split(key, 6)

    def linear(kw, kb, fan_in, fan_out):
        bound = 1.0 / jnp.sqrt(float(fan_in))
        w = jax.random.uniform(kw, (fan_in, fan_out), jnp.float32, -bound, bound)
        b = jax.random.uniform(kb, (1, fan_out), jnp.float32, -bound, bound)
        return w, b

    w1, b1 = linear(ks[0], ks[1], inc, hidden)
    w2, b2 = linear(ks[2], ks[3], hidden, hidden)
    w3, b3 = linear(ks[4], ks[5], hidden, 1)
    return (w1, b1, w2, b2, w3, b3)


def _ref_forward(x, params):
    """Pure-JAX f32 reference (matches the torch forward exactly)."""
    w1, b1, w2, b2, w3, b3 = params
    h1 = jnp.maximum(x @ w1 + b1, 0.0)
    h2 = jnp.maximum(h1 @ w2 + b2, 0.0)
    return jax.nn.sigmoid(h2 @ w3 + b3)


if __name__ == "__main__":
    key = jax.random.PRNGKey(0)
    k_x1, k_x2, k_p = jax.random.split(key, 3)

    INC, HIDDEN = 256, 512      # small shapes; the module default inc=4096 works too
    params = init_params(k_p, INC, HIDDEN)

    # bf16 MXU operands -> compare to the f32 reference at loose tolerance.
    TOL = 2e-2

    # Case 1: tiny batch -> single 128-row tile (single grid step).
    x1 = jax.random.normal(k_x1, (8, INC), dtype=jnp.float32)
    out1 = jax.block_until_ready(discriminator_forward(x1, params))
    assert out1.shape == (8, 1)
    assert jnp.allclose(out1, _ref_forward(x1, params), atol=TOL, rtol=TOL)

    # Case 2: batch not a multiple of the tile -> exercises padding + a
    # multi-step ("parallel") grid with the auto-selected tile.
    x2 = jax.random.normal(k_x2, (300, INC), dtype=jnp.float32)
    out2 = jax.block_until_ready(discriminator_forward(x2, params))
    assert out2.shape == (300, 1)
    assert jnp.allclose(out2, _ref_forward(x2, params), atol=TOL, rtol=TOL)

    # Case 3: explicit small tile cap -> 3 grid steps.
    out3 = jax.block_until_ready(discriminator_forward(x2, params, block_b=128))
    assert out3.shape == (300, 1)
    assert jnp.allclose(out3, _ref_forward(x2, params), atol=TOL, rtol=TOL)

    # TODO(synk): GradReverse only alters the backward pass (grad * -eta); a
    # custom_vjp around this forward would be needed for training parity.
    print("KERNEL_OK")
</pallas_src>

<mosaic_0001>
module attributes {stable_mosaic.version = 11 : i64} {
  func.func @discriminator_kernel(%arg0: i32, %arg1: memref<128x256xbf16, #tpu.memory_space<vmem>>, %arg2: memref<256x512xbf16, #tpu.memory_space<vmem>>, %arg3: memref<1x512xf32, #tpu.memory_space<vmem>>, %arg4: memref<512x512xbf16, #tpu.memory_space<vmem>>, %arg5: memref<1x512xf32, #tpu.memory_space<vmem>>, %arg6: memref<1x512xf32, #tpu.memory_space<vmem>>, %arg7: memref<1xf32, #tpu.memory_space<smem>>, %arg8: memref<128x1xf32, #tpu.memory_space<vmem>>) attributes {dimension_semantics = [#tpu.dimension_semantics<parallel>], iteration_bounds = array<i64: 1>, scalar_prefetch = 0 : i64, scratch_operands = 0 : i64, tpu.core_type = #tpu.core_type<tc>, window_params = [{transform_indices = @transform_0, window_bounds = array<i64: 128, 256>}, {pipeline_mode = #tpu.pipeline_mode<synchronous>, transform_indices = @transform_1, window_bounds = array<i64: 256, 512>}, {pipeline_mode = #tpu.pipeline_mode<synchronous>, transform_indices = @transform_2, window_bounds = array<i64: 1, 512>}, {pipeline_mode = #tpu.pipeline_mode<synchronous>, transform_indices = @transform_3, window_bounds = array<i64: 512, 512>}, {pipeline_mode = #tpu.pipeline_mode<synchronous>, transform_indices = @transform_4, window_bounds = array<i64: 1, 512>}, {pipeline_mode = #tpu.pipeline_mode<synchronous>, transform_indices = @transform_5, window_bounds = array<i64: 1, 512>}, {transform_indices = @transform_6, window_bounds = array<i64: 1>}, {transform_indices = @transform_7, window_bounds = array<i64: 128, 1>}]} {
    %c0 = arith.constant 0 : index
    %c0_0 = arith.constant 0 : index
    %0 = vector.load %arg1[%c0, %c0_0] : memref<128x256xbf16, #tpu.memory_space<vmem>>, vector<128x256xbf16>
    %c0_1 = arith.constant 0 : index
    %c0_2 = arith.constant 0 : index
    %1 = vector.load %arg2[%c0_1, %c0_2] : memref<256x512xbf16, #tpu.memory_space<vmem>>, vector<256x512xbf16>
    %cst = arith.constant dense<0.000000e+00> : vector<128x512xf32>
    %2 = tpu.matmul %0, %1, %cst {dimension_numbers = #tpu.dot_dimension_numbers<[1], [0], [0], [1], [0, 0, 1, 1], [], []>} : vector<128x256xbf16>, vector<256x512xbf16>, vector<128x512xf32> -> vector<128x512xf32>
    %c0_3 = arith.constant 0 : index
    %c0_4 = arith.constant 0 : index
    %3 = vector.load %arg3[%c0_3, %c0_4] : memref<1x512xf32, #tpu.memory_space<vmem>>, vector<1x512xf32>
    %4 = vector.broadcast %3 : vector<1x512xf32> to vector<128x512xf32>
    %5 = arith.addf %2, %4 : vector<128x512xf32>
    %cst_5 = arith.constant 0.000000e+00 : f32
    %6 = vector.broadcast %cst_5 : f32 to vector<128x512xf32>
    %7 = arith.maximumf %5, %6 : vector<128x512xf32>
    %8 = arith.truncf %7 : vector<128x512xf32> to vector<128x512xbf16>
    %c0_6 = arith.constant 0 : index
    %c0_7 = arith.constant 0 : index
    %9 = vector.load %arg4[%c0_6, %c0_7] : memref<512x512xbf16, #tpu.memory_space<vmem>>, vector<512x512xbf16>
    %cst_8 = arith.constant dense<0.000000e+00> : vector<128x512xf32>
    %10 = tpu.matmul %8, %9, %cst_8 {dimension_numbers = #tpu.dot_dimension_numbers<[1], [0], [0], [1], [0, 0, 1, 1], [], []>} : vector<128x512xbf16>, vector<512x512xbf16>, vector<128x512xf32> -> vector<128x512xf32>
    %c0_9 = arith.constant 0 : index
    %c0_10 = arith.constant 0 : index
    %11 = vector.load %arg5[%c0_9, %c0_10] : memref<1x512xf32, #tpu.memory_space<vmem>>, vector<1x512xf32>
    %12 = vector.broadcast %11 : vector<1x512xf32> to vector<128x512xf32>
    %13 = arith.addf %10, %12 : vector<128x512xf32>
    %cst_11 = arith.constant 0.000000e+00 : f32
    %14 = vector.broadcast %cst_11 : f32 to vector<128x512xf32>
    %15 = arith.maximumf %13, %14 : vector<128x512xf32>
    %c0_12 = arith.constant 0 : index
    %c0_13 = arith.constant 0 : index
    %16 = vector.load %arg6[%c0_12, %c0_13] : memref<1x512xf32, #tpu.memory_space<vmem>>, vector<1x512xf32>
    %17 = vector.broadcast %16 : vector<1x512xf32> to vector<128x512xf32>
    %18 = arith.mulf %15, %17 : vector<128x512xf32>
    %cst_14 = arith.constant dense<0.000000e+00> : vector<128xf32>
    %19 = vector.multi_reduction <add>, %18, %cst_14 [1] : vector<128x512xf32> to vector<128xf32>
    %20 = vector.shape_cast %19 : vector<128xf32> to vector<128x1xf32>
    %c0_15 = arith.constant 0 : index
    %21 = memref.load %arg7[%c0_15] : memref<1xf32, #tpu.memory_space<smem>>
    %22 = vector.broadcast %21 : f32 to vector<128x1xf32>
    %23 = arith.addf %20, %22 : vector<128x1xf32>
    %24 = arith.negf %23 : vector<128x1xf32>
    %25 = math.exp %24 : vector<128x1xf32>
    %cst_16 = arith.constant 1.000000e+00 : f32
    %26 = vector.broadcast %cst_16 : f32 to vector<128x1xf32>
    %27 = arith.addf %26, %25 : vector<128x1xf32>
    %28 = arith.divf %26, %27 : vector<128x1xf32>
    %c0_17 = arith.constant 0 : index
    %c0_18 = arith.constant 0 : index
    %29 = vector.load %arg8[%c0_17, %c0_18] : memref<128x1xf32, #tpu.memory_space<vmem>>, vector<128x1xf32>
    tpu.vector_store %arg8[%c0_17, %c0_18], %28 {strides = array<i32>} : memref<128x1xf32, #tpu.memory_space<vmem>>, vector<128x1xf32>,
    return
  }
  func.func @transform_0(%arg0: i32) -> (i32, i32) {
    %c0_i32 = arith.constant 0 : i32
    %c0_i32_0 = arith.constant 0 : i32
    return %arg0, %c0_i32 : i32, i32
  }
  func.func @transform_1(%arg0: i32) -> (i32, i32) {
    %c0_i32 = arith.constant 0 : i32
    %c0_i32_0 = arith.constant 0 : i32
    %c0_i32_1 = arith.constant 0 : i32
    return %c0_i32, %c0_i32_0 : i32, i32
  }
  func.func @transform_2(%arg0: i32) -> (i32, i32) {
    %c0_i32 = arith.constant 0 : i32
    %c0_i32_0 = arith.constant 0 : i32
    %c0_i32_1 = arith.constant 0 : i32
    return %c0_i32, %c0_i32_0 : i32, i32
  }
  func.func @transform_3(%arg0: i32) -> (i32, i32) {
    %c0_i32 = arith.constant 0 : i32
    %c0_i32_0 = arith.constant 0 : i32
    %c0_i32_1 = arith.constant 0 : i32
    return %c0_i32, %c0_i32_0 : i32, i32
  }
  func.func @transform_4(%arg0: i32) -> (i32, i32) {
    %c0_i32 = arith.constant 0 : i32
    %c0_i32_0 = arith.constant 0 : i32
    %c0_i32_1 = arith.constant 0 : i32
    return %c0_i32, %c0_i32_0 : i32, i32
  }
  func.func @transform_5(%arg0: i32) -> (i32, i32) {
    %c0_i32 = arith.constant 0 : i32
    %c0_i32_0 = arith.constant 0 : i32
    %c0_i32_1 = arith.constant 0 : i32
    return %c0_i32, %c0_i32_0 : i32, i32
  }
  func.func @transform_6(%arg0: i32) -> i32 {
    %c0_i32 = arith.constant 0 : i32
    %c0_i32_0 = arith.constant 0 : i32
    return %c0_i32 : i32
  }
  func.func @transform_7(%arg0: i32) -> (i32, i32) {
    %c0_i32 = arith.constant 0 : i32
    %c0_i32_0 = arith.constant 0 : i32
    return %arg0, %c0_i32 : i32, i32
  }
}

</mosaic_0001>

<bundles_post_ra>
// kernel: tpu_custom_call.1
= control target key start
LH: loop header
LB: loop body
LE: loop exit
PB: predicated region body
PF: predicated region fallthrough
CT: control target
= control target key end

     0   :  { %13 = vsyncpa [#allocation4], 0  ;;  %s3811_s0 = inlined_call_operand.hbm [shape: bf16[128,256], index: 0, kind: input, shape index: {}]   ;;  %s3812_s1 = inlined_call_operand.hbm [shape: bf16[256,512], index: 1, kind: input, shape index: {}]   ;;  %s3813_s2 = inlined_call_operand.vmem [shape: f32[1,512], index: 2, kind: input, shape index: {}]   ;;  %s3814_s3 = inlined_call_operand.hbm [shape: bf16[512,512], index: 3, kind: input, shape index: {}]   ;;  %s3815_s4 = inlined_call_operand.vmem [shape: f32[1,512], index: 4, kind: input, shape index: {}]   ;;  %s3816_s5 = inlined_call_operand.vmem [shape: f32[1,512], index: 5, kind: input, shape index: {}]   ;;  %s3817_s6 = inlined_call_operand.<no memory space> [shape: f32[1], index: 6, kind: input, shape index: {}]   ;;  %s3818_s7 = inlined_call_operand.vmem [shape: f32[128,1], index: 7, kind: output, shape index: {}]  }
   0x1   :  { %14 = vsyncpa [#allocation6], 0  ;;  %s3306_s24 = smov [#allocation5]   ;;  %s3236_s28 = scalar_lea.hbm %s3812_s1, 8192 }
   0x2   :  { %s32_s25 = sshll.u32 %s3306_s24, 4  ;;  %p3237_p0 = scmp.ne.s32.totalorder %s3812_s1, %s3236_s28  ;;  %s33_s25 = int_to_ptr.vmem [resolvable:$true] %s32_s25 }
   0x3   :  { %p3240_p1 = scmp.lt.u32.totalorder %s3236_s28, %s3812_s1 }
   0x5   :  { %p3242_p2 = pnand %p3240_p1, %p3237_p0 }
   0x7   :  { %3245 = shalt.err (!%p3242_p2)
}
   0x8   :  { %s3246_s10 = scalar_lea.vmem %s33_s25, 8192  ;;  %p3251_p4 = scmp.lt.s32.totalorder %s33_s25, %s33_s25 }
   0x9   :  { %p3247_p3 = scmp.ne.s32.totalorder %s33_s25, %s3246_s10  ;;  %p3252_p5 = scmp.lt.s32.totalorder %s3246_s10, %s3246_s10 }
   0xb   :  { %p3253_p6 = por %p3252_p5, %p3251_p4 }
   0xd   :  { %p3254_p7 = pnand %p3253_p6, %p3247_p3 }
   0xf   :  { %3257 = shalt.err (!%p3254_p7)
}
  0x10   :  { %s3307_s11 = smov 256   ;;  %s3308_s12 = smov 16  }
  0x11   :  { %38 = dma.hbm_to_vmem [thread:$0]  %s3812_s1, 8192, %s33_s25, [#allocation6], %s3307_s11, %s3307_s11, %s3308_s12  }
  0x12   :  { %s3309_s15 = smov [#allocation3]   ;;  %s3258_s19 = scalar_lea.hbm %s3811_s0, 2048 }
  0x13   :  { %s20_s16 = sshll.u32 %s3309_s15, 4  ;;  %p3259_p8 = scmp.ne.s32.totalorder %s3811_s0, %s3258_s19  ;;  %s21_s16 = int_to_ptr.vmem [resolvable:$true] %s20_s16 }
  0x14   :  { %p3262_p9 = scmp.lt.u32.totalorder %s3258_s19, %s3811_s0 }
  0x16   :  { %p3264_p10 = pnand %p3262_p9, %p3259_p8 }
  0x18   :  { %3267 = shalt.err (!%p3264_p10)
}
  0x19   :  { %s3268_s24 = scalar_lea.vmem %s21_s16, 2048  ;;  %p3273_p12 = scmp.lt.s32.totalorder %s21_s16, %s21_s16 }
  0x1a   :  { %p3269_p11 = scmp.ne.s32.totalorder %s21_s16, %s3268_s24  ;;  %p3274_p13 = scmp.lt.s32.totalorder %s3268_s24, %s3268_s24 }
  0x1c   :  { %p3275_p0 = por %p3274_p13, %p3273_p12 }
  0x1e   :  { %p3276_p1 = pnand %p3275_p0, %p3269_p11 }
  0x20   :  { %3279 = shalt.err (!%p3276_p1)
}
  0x21   :  { %s3310_s1 = smov 128   ;;  %s3311_s25 = smov 8  }
  0x22   :  { %26 = dma.hbm_to_vmem [thread:$0]  %s3811_s0, 2048, %s21_s16, [#allocation4], %s3310_s1, %s3310_s1, %s3311_s25  }
  0x23   :  { %s3312_s28 = smov [#allocation7]   ;;  %s3280_s9 = scalar_lea.hbm %s3814_s3, 16384 }
  0x24   :  { %s46_s29 = sshll.u32 %s3312_s28, 4  ;;  %p3281_p2 = scmp.ne.s32.totalorder %s3814_s3, %s3280_s9  ;;  %s47_s29 = int_to_ptr.vmem [resolvable:$true] %s46_s29 }
  0x25   :  { %p3284_p3 = scmp.lt.u32.totalorder %s3280_s9, %s3814_s3 }
  0x27   :  { %p3286_p4 = pnand %p3284_p3, %p3281_p2 }
  0x29   :  { %3289 = shalt.err (!%p3286_p4)
}
  0x2a   :  { %s3290_s17 = scalar_lea.vmem %s47_s29, 16384  ;;  %p3295_p6 = scmp.lt.s32.totalorder %s47_s29, %s47_s29 }
  0x2b   :  { %p3291_p5 = scmp.ne.s32.totalorder %s47_s29, %s3290_s17  ;;  %p3296_p7 = scmp.lt.s32.totalorder %s3290_s17, %s3290_s17 }
  0x2d   :  { %p3297_p8 = por %p3296_p7, %p3295_p6 }
  0x2f   :  { %p3298_p9 = pnand %p3297_p8, %p3291_p5 }
  0x31   :  { %3301 = shalt.err (!%p3298_p9)
}
  0x32   :  { %52 = dma.hbm_to_vmem [thread:$0]  %s3814_s3, 16384, %s47_s29, [#allocation6], %s3307_s11, %s3307_s11, %s3308_s12  }
  0x33   :  { %3302 = dma.done.wait [#allocation4], 2048  }
  0x34   :  { %3303 = vsyncadd [#allocation4], 4294965248 }
  0x35   :  { %3304 = dma.done.wait [#allocation6], 24576  }
  0x36   :  { %3305 = vsyncadd [#allocation6], 4294942720  ;;  %v2860_v0 = vld [vmem:[#allocation5 + $0x4] ss:$16 sps:$4 sm:$0xff]   ;;  %v2862_v1 = vld [vmem:[#allocation5] ss:$16 sps:$4 sm:$0xff]  }
  0x37   :  { %570 = vmatprep.subr.bf16.mxu0 %v2860_v0  ;;  %v2863_v2 = vld [vmem:[#allocation5 + $0x24] ss:$16 sps:$4 sm:$0xff]   ;;  %v2865_v3 = vld [vmem:[#allocation5 + $0x20] ss:$16 sps:$4 sm:$0xff]   ;;  %v2908_v14 = vld [vmem:[#allocation5 + $0xc] ss:$16 sps:$4 sm:$0xff]  }
  0x38   :  { %571 = vmatpush1.bf16.msra.mxu0 %v2862_v1  ;;  %v2866_v4 = vld [vmem:[#allocation5 + $0x44] ss:$16 sps:$4 sm:$0xff]   ;;  %v2868_v5 = vld [vmem:[#allocation5 + $0x40] ss:$16 sps:$4 sm:$0xff]   ;;  %v2910_v15 = vld [vmem:[#allocation5 + $0x8] ss:$16 sps:$4 sm:$0xff]   ;;  %683 = vmatprep.subr.bf16.mxu1 %v2908_v14 }
  0x39   :  { %572 = vmatprep.subr.bf16.mxu0 %v2863_v2  ;;  %v2869_v6 = vld [vmem:[#allocation5 + $0x64] ss:$16 sps:$4 sm:$0xff]   ;;  %v2871_v7 = vld [vmem:[#allocation5 + $0x60] ss:$16 sps:$4 sm:$0xff]   ;;  %v2914_v18 = vld [vmem:[#allocation5 + $0x2c] ss:$16 sps:$4 sm:$0xff]   ;;  %684 = vmatpush1.bf16.msra.mxu1 %v2910_v15 }
  0x3a   :  { %v2872_v8 = vld [vmem:[#allocation5 + $0x84] ss:$16 sps:$4 sm:$0xff]   ;;  %v2874_v9 = vld [vmem:[#allocation5 + $0x80] ss:$16 sps:$4 sm:$0xff]   ;;  %v2916_v19 = vld [vmem:[#allocation5 + $0x28] ss:$16 sps:$4 sm:$0xff]   ;;  %685 = vmatprep.subr.bf16.mxu1 %v2914_v18 }
  0x3b   :  { %v2875_v10 = vld [vmem:[#allocation5 + $0xa4] ss:$16 sps:$4 sm:$0xff]   ;;  %v2877_v11 = vld [vmem:[#allocation5 + $0xa0] ss:$16 sps:$4 sm:$0xff]   ;;  %v2917_v20 = vld [vmem:[#allocation5 + $0x4c] ss:$16 sps:$4 sm:$0xff]  }
  0x3c   :  { %573 = vmatpush1.bf16.msra.mxu0 %v2865_v3  ;;  %v2878_v12 = vld [vmem:[#allocation5 + $0xc4] ss:$16 sps:$4 sm:$0xff]   ;;  %v2880_v13 = vld [vmem:[#allocation5 + $0xc0] ss:$16 sps:$4 sm:$0xff]   ;;  %v2919_v23 = vld [vmem:[#allocation5 + $0x48] ss:$16 sps:$4 sm:$0xff]  }
  0x3d   :  { %574 = vmatprep.subr.bf16.mxu0 %v2866_v4  ;;  %v2881_v16 = vld [vmem:[#allocation5 + $0xe4] ss:$16 sps:$4 sm:$0xff]   ;;  %v2883_v21 = vld [vmem:[#allocation5 + $0xe0] ss:$16 sps:$4 sm:$0xff]   ;;  %686 = vmatpush1.bf16.msra.mxu1 %v2916_v19  ;;  %v2923_v24 = vld [vmem:[#allocation5 + $0x6c] ss:$16 sps:$4 sm:$0xff]  }
  0x3e   :  { %v2913_v17 = vld [vmem:[#allocation3 + $0x4] ss:$8 sps:$4 sm:$0xff]   ;;  %687 = vmatprep.subr.bf16.mxu1 %v2917_v20  ;;  %v2886_v25 = vld [vmem:[#allocation5 + $0x100] ss:$16 sps:$4 sm:$0xff]   ;;  %v2925_v27 = vld [vmem:[#allocation5 + $0x68] ss:$16 sps:$4 sm:$0xff]  }
  0x3f   :  { %602 = vmatprep.mubr.bf16.mxu0 %v2913_v17  ;;  %715 = vmatprep.mubr.bf16.mxu1 %v2913_v17  ;;  %v2884_v22 = vld [vmem:[#allocation5 + $0x104] ss:$16 sps:$4 sm:$0xff]   ;;  %v2926_v28 = vld [vmem:[#allocation5 + $0x8c] ss:$16 sps:$4 sm:$0xff]   ;;  %v2889_v29 = vld [vmem:[#allocation5 + $0x120] ss:$16 sps:$4 sm:$0xff]  }
  0x40   :  { %575 = vmatpush1.bf16.msra.mxu0 %v2868_v5  ;;  %v2887_v26 = vld [vmem:[#allocation5 + $0x124] ss:$16 sps:$4 sm:$0xff]   ;;  %v2928_v31 = vld [vmem:[#allocation5 + $0x88] ss:$16 sps:$4 sm:$0xff]   ;;  %v2932_v32 = vld [vmem:[#allocation5 + $0xac] ss:$16 sps:$4 sm:$0xff]  }
  0x41   :  { %576 = vmatprep.subr.bf16.mxu0 %v2869_v6  ;;  %688 = vmatpush1.bf16.msra.mxu1 %v2919_v23  ;;  %v2890_v30 = vld [vmem:[#allocation5 + $0x144] ss:$16 sps:$4 sm:$0xff]   ;;  %v2892_v33 = vld [vmem:[#allocation5 + $0x140] ss:$16 sps:$4 sm:$0xff]   ;;  %v2934_v35 = vld [vmem:[#allocation5 + $0xa8] ss:$16 sps:$4 sm:$0xff]  }
  0x42   :  { %689 = vmatprep.subr.bf16.mxu1 %v2923_v24  ;;  %v2893_v34 = vld [vmem:[#allocation5 + $0x164] ss:$16 sps:$4 sm:$0xff]   ;;  %v2935_v36 = vld [vmem:[#allocation5 + $0xcc] ss:$16 sps:$4 sm:$0xff]   ;;  %v2895_v37 = vld [vmem:[#allocation5 + $0x160] ss:$16 sps:$4 sm:$0xff]  }
  0x43   :  { %v2896_v38 = vld [vmem:[#allocation5 + $0x184] ss:$16 sps:$4 sm:$0xff]   ;;  %v2937_v39 = vld [vmem:[#allocation5 + $0xc8] ss:$16 sps:$4 sm:$0xff]   ;;  %v2941_v40 = vld [vmem:[#allocation5 + $0xec] ss:$16 sps:$4 sm:$0xff]  }
  0x44   :  { %577 = vmatpush1.bf16.msra.mxu0 %v2871_v7  ;;  %v2898_v41 = vld [vmem:[#allocation5 + $0x180] ss:$16 sps:$4 sm:$0xff]   ;;  %v2899_v42 = vld [vmem:[#allocation5 + $0x1a4] ss:$16 sps:$4 sm:$0xff]   ;;  %v2943_v43 = vld [vmem:[#allocation5 + $0xe8] ss:$16 sps:$4 sm:$0xff]  }
  0x45   :  { %578 = vmatprep.subr.bf16.mxu0 %v2872_v8  ;;  %690 = vmatpush1.bf16.msra.mxu1 %v2925_v27  ;;  %v2944_v44 = vld [vmem:[#allocation5 + $0x10c] ss:$16 sps:$4 sm:$0xff]   ;;  %v2901_v45 = vld [vmem:[#allocation5 + $0x1a0] ss:$16 sps:$4 sm:$0xff]   ;;  %v2902_v46 = vld [vmem:[#allocation5 + $0x1c4] ss:$16 sps:$4 sm:$0xff]  }
  0x46   :  { %691 = vmatprep.subr.bf16.mxu1 %v2926_v28  ;;  %v2946_v47 = vld [vmem:[#allocation5 + $0x108] ss:$16 sps:$4 sm:$0xff]   ;;  %v2950_v48 = vld [vmem:[#allocation5 + $0x12c] ss:$16 sps:$4 sm:$0xff]   ;;  %v2904_v49 = vld [vmem:[#allocation5 + $0x1c0] ss:$16 sps:$4 sm:$0xff]  }
  0x47   :  { %v2905_v50 = vld [vmem:[#allocation5 + $0x1e4] ss:$16 sps:$4 sm:$0xff]   ;;  %v2952_v51 = vld [vmem:[#allocation5 + $0x128] ss:$16 sps:$4 sm:$0xff]   ;;  %v2953_v52 = vld [vmem:[#allocation5 + $0x14c] ss:$16 sps:$4 sm:$0xff]  }
  0x48   :  { %579 = vmatpush1.bf16.msra.mxu0 %v2874_v9  ;;  %v2907_v53 = vld [vmem:[#allocation5 + $0x1e0] ss:$16 sps:$4 sm:$0xff]   ;;  %v2982_v54 = vld [vmem:[#allocation7 + $0x4] ss:$16 sps:$4 sm:$0xff]   ;;  %v2955_v55 = vld [vmem:[#allocation5 + $0x148] ss:$16 sps:$4 sm:$0xff]  }
  0x49   :  { %580 = vmatprep.subr.bf16.mxu0 %v2875_v10  ;;  %692 = vmatpush1.bf16.msra.mxu1 %v2928_v31  ;;  %v3395_v56 = vld [vmem:[#allocation3] ss:$8 sps:$4 sm:$0xff]   ;;  %v2959_v57 = vld [vmem:[#allocation5 + $0x16c] ss:$16 sps:$4 sm:$0xff]   ;;  %v2988_v60 = vld [vmem:[#allocation7 + $0x24] ss:$16 sps:$4 sm:$0xff]  }
  0x4a   :  { %693 = vmatprep.subr.bf16.mxu1 %v2932_v32  ;;  %v3397_v58 = vld [vmem:[#allocation3 + $0x14] ss:$8 sps:$4 sm:$0xff]   ;;  %v2980_v59 = vld [vmem:[#allocation7] ss:$16 sps:$4 sm:$0xff]   ;;  %v2961_v61 = vld [vmem:[#allocation5 + $0x168] ss:$16 sps:$4 sm:$0xff]  }
  0x4b   :  { %v2962_v62 = vld [vmem:[#allocation5 + $0x18c] ss:$16 sps:$4 sm:$0xff]   ;;  %v2986_v63 = vld [vmem:[#allocation7 + $0x20] ss:$16 sps:$4 sm:$0xff]   ;;  %v2994_v0 = vld [vmem:[#allocation7 + $0x44] ss:$16 sps:$4 sm:$0xff]  }
  0x4c   :  { %581 = vmatpush1.bf16.msra.mxu0 %v2877_v11  ;;  %v2964_v1 = vld [vmem:[#allocation5 + $0x188] ss:$16 sps:$4 sm:$0xff]   ;;  %v2968_v3 = vld [vmem:[#allocation5 + $0x1ac] ss:$16 sps:$4 sm:$0xff]   ;;  %v2992_v5 = vld [vmem:[#allocation7 + $0x40] ss:$16 sps:$4 sm:$0xff]  }
  0x4d   :  { %582 = vmatprep.subr.bf16.mxu0 %v2878_v12  ;;  %694 = vmatpush1.bf16.msra.mxu1 %v2934_v35  ;;  %v3401_v2 = vld [vmem:[#allocation3 + $0x10] ss:$8 sps:$4 sm:$0xff]   ;;  %v3403_v4 = vld [vmem:[#allocation3 + $0x24] ss:$8 sps:$4 sm:$0xff]   ;;  %v3407_v12 = vld [vmem:[#allocation3 + $0x20] ss:$8 sps:$4 sm:$0xff]  }
  0x4e   :  { %695 = vmatprep.subr.bf16.mxu1 %v2935_v36  ;;  %v3000_v6 = vld [vmem:[#allocation7 + $0x64] ss:$16 sps:$4 sm:$0xff]   ;;  %v2970_v7 = vld [vmem:[#allocation5 + $0x1a8] ss:$16 sps:$4 sm:$0xff]   ;;  %v2971_v8 = vld [vmem:[#allocation5 + $0x1cc] ss:$16 sps:$4 sm:$0xff]  }
  0x4f   :  { %v2998_v9 = vld [vmem:[#allocation7 + $0x60] ss:$16 sps:$4 sm:$0xff]   ;;  %v3006_v10 = vld [vmem:[#allocation7 + $0x84] ss:$16 sps:$4 sm:$0xff]   ;;  %v2973_v11 = vld [vmem:[#allocation5 + $0x1c8] ss:$16 sps:$4 sm:$0xff]  }
  0x50   :  { %583 = vmatpush1.bf16.msra.mxu0 %v2880_v13  ;;  %v2977_v13 = vld [vmem:[#allocation5 + $0x1ec] ss:$16 sps:$4 sm:$0xff]   ;;  %v3004_v15 = vld [vmem:[#allocation7 + $0x80] ss:$16 sps:$4 sm:$0xff]   ;;  %v2979_v17 = vld [vmem:[#allocation5 + $0x1e8] ss:$16 sps:$4 sm:$0xff]  }
  0x51   :  { %584 = vmatprep.subr.bf16.mxu0 %v2881_v16  ;;  %696 = vmatpush1.bf16.msra.mxu1 %v2937_v39  ;;  %v3409_v14 = vld [vmem:[#allocation3 + $0x34] ss:$8 sps:$4 sm:$0xff]   ;;  %v3010_v19 = vld [vmem:[#allocation7 + $0xa0] ss:$16 sps:$4 sm:$0xff]   ;;  %v3415_v24 = vld [vmem:[#allocation3 + $0x44] ss:$8 sps:$4 sm:$0xff]  }
  0x52   :  { %697 = vmatprep.subr.bf16.mxu1 %v2941_v40  ;;  %v3012_v16 = vld [vmem:[#allocation7 + $0xa4] ss:$16 sps:$4 sm:$0xff]   ;;  %v2985_v18 = vld [vmem:[#allocation7 + $0xc] ss:$16 sps:$4 sm:$0xff]   ;;  %v2989_v27 = vld [vmem:[#allocation7 + $0x28] ss:$16 sps:$4 sm:$0xff]  }
  0x53   :  { %v3018_v20 = vld [vmem:[#allocation7 + $0xc4] ss:$16 sps:$4 sm:$0xff]   ;;  %v2991_v23 = vld [vmem:[#allocation7 + $0x2c] ss:$16 sps:$4 sm:$0xff]   ;;  %v2995_v31 = vld [vmem:[#allocation7 + $0x48] ss:$16 sps:$4 sm:$0xff]  }
  0x54   :  { %585 = vmatpush1.bf16.msra.mxu0 %v2883_v21  ;;  %v2983_v21 = vld [vmem:[#allocation7 + $0x8] ss:$16 sps:$4 sm:$0xff]   ;;  %v2997_v28 = vld [vmem:[#allocation7 + $0x4c] ss:$16 sps:$4 sm:$0xff]   ;;  %v3028_v35 = vld [vmem:[#allocation7 + $0x100] ss:$16 sps:$4 sm:$0xff]  }
  0x55   :  { %586 = vmatprep.subr.bf16.mxu0 %v2884_v22  ;;  %698 = vmatpush1.bf16.msra.mxu1 %v2943_v43  ;;  %v3413_v22 = vld [vmem:[#allocation3 + $0x30] ss:$8 sps:$4 sm:$0xff]   ;;  %v3421_v32 = vld [vmem:[#allocation3 + $0x40] ss:$8 sps:$4 sm:$0xff]   ;;  %v3036_v36 = vld [vmem:[#allocation7 + $0x124] ss:$16 sps:$4 sm:$0xff]  }
  0x56   :  { %699 = vmatprep.subr.bf16.mxu1 %v2944_v44  ;;  %v3034_v39 = vld [vmem:[#allocation7 + $0x120] ss:$16 sps:$4 sm:$0xff]   ;;  %v3042_v40 = vld [vmem:[#allocation7 + $0x144] ss:$16 sps:$4 sm:$0xff]   ;;  %v3015_v43 = vld [vmem:[#allocation7 + $0xac] ss:$16 sps:$4 sm:$0xff]  }
  0x57   :  { %v2965_v44 = vld [vmem:[#allocation3 + $0x64] ss:$8 sps:$4 sm:$0xff]   ;;  %vm2478_vm0 = vcmask 7168  }
  0x58   :  { %587 = vmatpush1.bf16.msra.mxu0 %v2886_v25  ;;  %v3016_v25 = vld [vmem:[#allocation7 + $0xc0] ss:$16 sps:$4 sm:$0xff]  }
  0x59   :  { %588 = vmatprep.subr.bf16.mxu0 %v2887_v26  ;;  %700 = vmatpush1.bf16.msra.mxu1 %v2946_v47  ;;  %v3024_v26 = vld [vmem:[#allocation7 + $0xe4] ss:$16 sps:$4 sm:$0xff]   ;;  %v3013_v47 = vld [vmem:[#allocation7 + $0xa8] ss:$16 sps:$4 sm:$0xff]  }
  0x5a   :  { %701 = vmatprep.subr.bf16.mxu1 %v2950_v48  ;;  %v3021_v48 = vld [vmem:[#allocation7 + $0xcc] ss:$16 sps:$4 sm:$0xff]  }
  0x5c   :  { %589 = vmatpush1.bf16.msra.mxu0 %v2889_v29  ;;  %v3022_v29 = vld [vmem:[#allocation7 + $0xe0] ss:$16 sps:$4 sm:$0xff]  }
  0x5d   :  { %590 = vmatprep.subr.bf16.mxu0 %v2890_v30  ;;  %702 = vmatpush1.bf16.msra.mxu1 %v2952_v51  ;;  %v3030_v30 = vld [vmem:[#allocation7 + $0x104] ss:$16 sps:$4 sm:$0xff]   ;;  %v3019_v51 = vld [vmem:[#allocation7 + $0xc8] ss:$16 sps:$4 sm:$0xff]  }
  0x5e   :  { %703 = vmatprep.subr.bf16.mxu1 %v2953_v52  ;;  %v2967_v52 = vld [vmem:[#allocation3 + $0x60] ss:$8 sps:$4 sm:$0xff]  }
  0x60   :  { %591 = vmatpush1.bf16.msra.mxu0 %v2892_v33  ;;  %v3003_v33 = vld [vmem:[#allocation7 + $0x6c] ss:$16 sps:$4 sm:$0xff]  }
  0x61   :  { %592 = vmatprep.subr.bf16.mxu0 %v2893_v34  ;;  %704 = vmatpush1.bf16.msra.mxu1 %v2955_v55  ;;  %v3423_v34 = vld [vmem:[#allocation3 + $0x54] ss:$8 sps:$4 sm:$0xff]   ;;  %v3052_v55 = vld [vmem:[#allocation7 + $0x180] ss:$16 sps:$4 sm:$0xff]  }
  0x62   :  { %705 = vmatprep.subr.bf16.mxu1 %v2959_v57  ;;  %v3025_v57 = vld [vmem:[#allocation7 + $0xe8] ss:$16 sps:$4 sm:$0xff]  }
  0x64   :  { %593 = vmatpush1.bf16.msra.mxu0 %v2895_v37  ;;  %v3001_v37 = vld [vmem:[#allocation7 + $0x68] ss:$16 sps:$4 sm:$0xff]  }
  0x65   :  { %594 = vmatprep.subr.bf16.mxu0 %v2896_v38  ;;  %706 = vmatpush1.bf16.msra.mxu1 %v2961_v61  ;;  %v3009_v38 = vld [vmem:[#allocation7 + $0x8c] ss:$16 sps:$4 sm:$0xff]   ;;  %v2976_v61 = vld [vmem:[#allocation3 + $0x70] ss:$8 sps:$4 sm:$0xff]  }
  0x66   :  { %707 = vmatprep.subr.bf16.mxu1 %v2962_v62  ;;  %v3039_v62 = vld [vmem:[#allocation7 + $0x12c] ss:$16 sps:$4 sm:$0xff]  }
  0x68   :  { %595 = vmatpush1.bf16.msra.mxu0 %v2898_v41  ;;  %v3007_v41 = vld [vmem:[#allocation7 + $0x88] ss:$16 sps:$4 sm:$0xff]  }
  0x69   :  { %596 = vmatprep.subr.bf16.mxu0 %v2899_v42  ;;  %708 = vmatpush1.bf16.msra.mxu1 %v2964_v1  ;;  %v2958_v42 = vld [vmem:[#allocation3 + $0x50] ss:$8 sps:$4 sm:$0xff]  }
  0x6a   :  { %709 = vmatprep.subr.bf16.mxu1 %v2968_v3  ;;  %v3043_v1 = vld [vmem:[#allocation7 + $0x148] ss:$16 sps:$4 sm:$0xff]  }
  0x6b   :  { %v3049_v3 = vld [vmem:[#allocation7 + $0x168] ss:$16 sps:$4 sm:$0xff]  }
  0x6c   :  { %597 = vmatpush1.bf16.msra.mxu0 %v2901_v45  ;;  %v3040_v45 = vld [vmem:[#allocation7 + $0x140] ss:$16 sps:$4 sm:$0xff]  }
  0x6d   :  { %598 = vmatprep.subr.bf16.mxu0 %v2902_v46  ;;  %710 = vmatpush1.bf16.msra.mxu1 %v2970_v7  ;;  %v3048_v46 = vld [vmem:[#allocation7 + $0x164] ss:$16 sps:$4 sm:$0xff]   ;;  %v3061_v7 = vld [vmem:[#allocation7 + $0x1a8] ss:$16 sps:$4 sm:$0xff]  }
  0x6e   :  { %711 = vmatprep.subr.bf16.mxu1 %v2971_v8  ;;  %v3066_v8 = vld [vmem:[#allocation7 + $0x1c4] ss:$16 sps:$4 sm:$0xff]  }
  0x70   :  { %599 = vmatpush1.bf16.msra.mxu0 %v2904_v49  ;;  %v3046_v49 = vld [vmem:[#allocation7 + $0x160] ss:$16 sps:$4 sm:$0xff]  }
  0x71   :  { %600 = vmatprep.subr.bf16.mxu0 %v2905_v50  ;;  %712 = vmatpush1.bf16.msra.mxu1 %v2973_v11  ;;  %v3054_v50 = vld [vmem:[#allocation7 + $0x184] ss:$16 sps:$4 sm:$0xff]   ;;  %v3067_v11 = vld [vmem:[#allocation7 + $0x1c8] ss:$16 sps:$4 sm:$0xff]  }
  0x72   :  { %713 = vmatprep.subr.bf16.mxu1 %v2977_v13  ;;  %v3075_v13 = vld [vmem:[#allocation7 + $0x1ec] ss:$16 sps:$4 sm:$0xff]  }
  0x74   :  { %601 = vmatpush1.bf16.msra.mxu0 %v2907_v53  ;;  %v3027_v53 = vld [vmem:[#allocation7 + $0xec] ss:$16 sps:$4 sm:$0xff]  }
  0x75   :  { %1682 = vmatprep.subr.bf16.mxu0 %v2982_v54  ;;  %714 = vmatpush1.bf16.msra.mxu1 %v2979_v17  ;;  %v2974_v54 = vld [vmem:[#allocation3 + $0x74] ss:$8 sps:$4 sm:$0xff]  }
  0x76   :  { %1908 = vmatprep.subr.bf16.mxu1 %v2985_v18  ;;  %v3081_v17 = vld [vmem:[#allocation7 + $0x20c] ss:$16 sps:$4 sm:$0xff]   ;;  %v150_v18 = vlaneseq }
  0x77   :  { %603 = vmatmul.mubr.bf16.vlgmr.msra.gmra.mrb[0].mxu0 %v3395_v56 }
  0x78   :  { %612 = vmatprep.mubr.bf16.mxu0 %v3397_v58  ;;  %1683 = vmatpush1.bf16.msra.mxu0 %v2980_v59  ;;  %v3058_v59 = vld [vmem:[#allocation7 + $0x1a0] ss:$16 sps:$4 sm:$0xff]  }
  0x79   :  { %1684 = vmatprep.subr.bf16.mxu0 %v2988_v60  ;;  %716 = vmatmul.mubr.bf16.vlgmr.msra.gmra.mrb[0].mxu1 %v3395_v56  ;;  %v3060_v56 = vld [vmem:[#allocation7 + $0x1a4] ss:$16 sps:$4 sm:$0xff]   ;;  %v3031_v60 = vld [vmem:[#allocation7 + $0x108] ss:$16 sps:$4 sm:$0xff]  }
  0x7a   :  { %725 = vmatprep.mubr.bf16.mxu1 %v3397_v58  ;;  %1909 = vmatpush1.bf16.msra.mxu1 %v2983_v21  ;;  %v3033_v58 = vld [vmem:[#allocation7 + $0x10c] ss:$16 sps:$4 sm:$0xff]   ;;  %v3440_v21 = vld [vmem:[%s3813_s2] sm:$0xf] }
  0x7b   :  { %1910 = vmatprep.subr.bf16.mxu1 %v2991_v23 }
  0x7c   :  { %1685 = vmatpush1.bf16.msra.mxu0 %v2986_v63  ;;  %v3037_v63 = vld [vmem:[#allocation7 + $0x128] ss:$16 sps:$4 sm:$0xff]  }
  0x7d   :  { %1686 = vmatprep.subr.bf16.mxu0 %v2994_v0  ;;  %v3045_v0 = vld [vmem:[#allocation7 + $0x14c] ss:$16 sps:$4 sm:$0xff]  }
  0x7e   :  { %1911 = vmatpush1.bf16.msra.mxu1 %v2989_v27 }
  0x7f   :  { %613 = vmatmul.mubr.bf16.gmra.mrb[4].mxu0 %v3401_v2  ;;  %1912 = vmatprep.subr.bf16.mxu1 %v2997_v28 }
  0x80   :  { %622 = vmatprep.mubr.bf16.mxu0 %v3403_v4  ;;  %1687 = vmatpush1.bf16.msra.mxu0 %v2992_v5  ;;  %v3055_v5 = vld [vmem:[#allocation7 + $0x188] ss:$16 sps:$4 sm:$0xff]  }
  0x81   :  { %1688 = vmatprep.subr.bf16.mxu0 %v3000_v6  ;;  %726 = vmatmul.mubr.bf16.gmra.mrb[4].mxu1 %v3401_v2  ;;  %v3051_v2 = vld [vmem:[#allocation7 + $0x16c] ss:$16 sps:$4 sm:$0xff]  }
  0x82   :  { %735 = vmatprep.mubr.bf16.mxu1 %v3403_v4  ;;  %1913 = vmatpush1.bf16.msra.mxu1 %v2995_v31  ;;  %v3057_v4 = vld [vmem:[#allocation7 + $0x18c] ss:$16 sps:$4 sm:$0xff]  }
  0x83   :  { %1914 = vmatprep.subr.bf16.mxu1 %v3003_v33  ;;  %v3063_v6 = vld [vmem:[#allocation7 + $0x1ac] ss:$16 sps:$4 sm:$0xff]  }
  0x84   :  { %1689 = vmatpush1.bf16.msra.mxu0 %v2998_v9  ;;  %v3069_v9 = vld [vmem:[#allocation7 + $0x1cc] ss:$16 sps:$4 sm:$0xff]  }
  0x85   :  { %1690 = vmatprep.subr.bf16.mxu0 %v3006_v10  ;;  %v3064_v10 = vld [vmem:[#allocation7 + $0x1c0] ss:$16 sps:$4 sm:$0xff]  }
  0x86   :  { %1915 = vmatpush1.bf16.msra.mxu1 %v3001_v37 }
  0x87   :  { %623 = vmatmul.mubr.bf16.gmra.mrb[8].mxu0 %v3407_v12  ;;  %1916 = vmatprep.subr.bf16.mxu1 %v3009_v38 }
  0x88   :  { %632 = vmatprep.mubr.bf16.mxu0 %v3409_v14  ;;  %1691 = vmatpush1.bf16.msra.mxu0 %v3004_v15  ;;  %v3073_v15 = vld [vmem:[#allocation7 + $0x1e8] ss:$16 sps:$4 sm:$0xff]  }
  0x89   :  { %1692 = vmatprep.subr.bf16.mxu0 %v3012_v16  ;;  %736 = vmatmul.mubr.bf16.gmra.mrb[8].mxu1 %v3407_v12  ;;  %v3072_v12 = vld [vmem:[#allocation7 + $0x1e4] ss:$16 sps:$4 sm:$0xff]  }
  0x8a   :  { %745 = vmatprep.mubr.bf16.mxu1 %v3409_v14  ;;  %1917 = vmatpush1.bf16.msra.mxu1 %v3007_v41  ;;  %v3070_v14 = vld [vmem:[#allocation7 + $0x1e0] ss:$16 sps:$4 sm:$0xff]   ;;  %v3078_v16 = vld [vmem:[#allocation7 + $0x204] ss:$16 sps:$4 sm:$0xff]   ;;  %v3079_v41 = vld [vmem:[#allocation7 + $0x208] ss:$16 sps:$4 sm:$0xff]  }
  0x8b   :  { %1918 = vmatprep.subr.bf16.mxu1 %v3015_v43 }
  0x8c   :  { %1693 = vmatpush1.bf16.msra.mxu0 %v3010_v19  ;;  %v151_v19 = vshrl.u32 %v150_v18, 7  ;;  %v3105_v18 = vld [vmem:[#allocation7 + $0x28c] ss:$16 sps:$4 sm:$0xff]  }
  0x8d   :  { %1694 = vmatprep.subr.bf16.mxu0 %v3018_v20 }
  0x8e   :  { %1919 = vmatpush1.bf16.msra.mxu1 %v3013_v47  ;;  %v3435_v20 = vsub.s32 0, %v151_v19 }
  0x8f   :  { %633 = vmatmul.mubr.bf16.gmra.mrb[12].mxu0 %v3413_v22  ;;  %1920 = vmatprep.subr.bf16.mxu1 %v3021_v48 }
  0x90   :  { %642 = vmatprep.mubr.bf16.mxu0 %v3415_v24  ;;  %1695 = vmatpush1.bf16.msra.mxu0 %v3016_v25  ;;  %v3446_v23 = vrot.slane %v3440_v21, %v3435_v20 }
  0x91   :  { %1696 = vmatprep.subr.bf16.mxu0 %v3024_v26  ;;  %746 = vmatmul.mubr.bf16.gmra.mrb[12].mxu1 %v3413_v22  ;;  %v3442_v22 = vsub.s32 1, %v151_v19 }
  0x92   :  { %755 = vmatprep.mubr.bf16.mxu1 %v3415_v24  ;;  %1921 = vmatpush1.bf16.msra.mxu1 %v3019_v51  ;;  %v3082_v51 = vld [vmem:[#allocation7 + $0x220] ss:$16 sps:$4 sm:$0xff]  }
  0x93   :  { %1922 = vmatprep.subr.bf16.mxu1 %v3027_v53  ;;  %v3450_v24 = vrot.slane %v3440_v21, %v3442_v22 }
  0x94   :  { %1697 = vmatpush1.bf16.msra.mxu0 %v3022_v29 }
  0x95   :  { %1698 = vmatprep.subr.bf16.mxu0 %v3030_v30 }
  0x96   :  { %1923 = vmatpush1.bf16.msra.mxu1 %v3025_v57 }
  0x97   :  { %643 = vmatmul.mubr.bf16.gmra.mrb[16].mxu0 %v3421_v32  ;;  %1924 = vmatprep.subr.bf16.mxu1 %v3033_v58 }
  0x98   :  { %652 = vmatprep.mubr.bf16.mxu0 %v3423_v34  ;;  %1699 = vmatpush1.bf16.msra.mxu0 %v3028_v35 }
  0x99   :  { %1700 = vmatprep.subr.bf16.mxu0 %v3036_v36  ;;  %756 = vmatmul.mubr.bf16.gmra.mrb[16].mxu1 %v3421_v32 }
  0x9a   :  { %765 = vmatprep.mubr.bf16.mxu1 %v3423_v34  ;;  %1925 = vmatpush1.bf16.msra.mxu1 %v3031_v60  ;;  %v3460_v60 = vsub.s32 2, %v151_v19 }
  0x9b   :  { %1926 = vmatprep.subr.bf16.mxu1 %v3039_v62 }
  0x9c   :  { %1701 = vmatpush1.bf16.msra.mxu0 %v3034_v39 }
  0x9d   :  { %1702 = vmatprep.subr.bf16.mxu0 %v3042_v40  ;;  %v3076_v40 = vld [vmem:[#allocation7 + $0x200] ss:$16 sps:$4 sm:$0xff]  }
  0x9e   :  { %1927 = vmatpush1.bf16.msra.mxu1 %v3037_v63  ;;  %v3088_v63 = vld [vmem:[#allocation7 + $0x240] ss:$16 sps:$4 sm:$0xff]  }
  0x9f   :  { %653 = vmatmul.mubr.bf16.gmra.mrb[20].mxu0 %v2958_v42  ;;  %1928 = vmatprep.subr.bf16.mxu1 %v3045_v0  ;;  %v3091_v0 = vld [vmem:[#allocation7 + $0x248] ss:$16 sps:$4 sm:$0xff]  }
  0xa0   :  { %662 = vmatprep.mubr.bf16.mxu0 %v2965_v44  ;;  %1703 = vmatpush1.bf16.msra.mxu0 %v3040_v45  ;;  %v3087_v45 = vld [vmem:[#allocation7 + $0x22c] ss:$16 sps:$4 sm:$0xff]  }
  0xa1   :  { %1704 = vmatprep.subr.bf16.mxu0 %v3048_v46  ;;  %766 = vmatmul.mubr.bf16.gmra.mrb[20].mxu1 %v2958_v42 }
  0xa2   :  { %775 = vmatprep.mubr.bf16.mxu1 %v2965_v44  ;;  %1929 = vmatpush1.bf16.msra.mxu1 %v3043_v1  ;;  %v3084_v44 = vld [vmem:[#allocation7 + $0x224] ss:$16 sps:$4 sm:$0xff]   ;;  %v3462_v1 = vsub.s32 3, %v151_v19 }
  0xa3   :  { %1930 = vmatprep.subr.bf16.mxu1 %v3051_v2 }
  0xa4   :  { %1705 = vmatpush1.bf16.msra.mxu0 %v3046_v49 }
  0xa5   :  { %1706 = vmatprep.subr.bf16.mxu0 %v3054_v50 }
  0xa6   :  { %1931 = vmatpush1.bf16.msra.mxu1 %v3049_v3 }
  0xa7   :  { %663 = vmatmul.mubr.bf16.gmra.mrb[24].mxu0 %v2967_v52  ;;  %1932 = vmatprep.subr.bf16.mxu1 %v3057_v4  ;;  %v3096_v4 = vld [vmem:[#allocation7 + $0x264] ss:$16 sps:$4 sm:$0xff]  }
  0xa8   :  { %672 = vmatprep.mubr.bf16.mxu0 %v2974_v54  ;;  %1707 = vmatpush1.bf16.msra.mxu0 %v3052_v55  ;;  %v3090_v55 = vld [vmem:[#allocation7 + $0x244] ss:$16 sps:$4 sm:$0xff]  }
  0xa9   :  { %1708 = vmatprep.subr.bf16.mxu0 %v3060_v56  ;;  %776 = vmatmul.mubr.bf16.gmra.mrb[24].mxu1 %v2967_v52  ;;  %v3085_v52 = vld [vmem:[#allocation7 + $0x228] ss:$16 sps:$4 sm:$0xff]   ;;  %v3093_v56 = vld [vmem:[#allocation7 + $0x24c] ss:$16 sps:$4 sm:$0xff]  }
  0xaa   :  { %785 = vmatprep.mubr.bf16.mxu1 %v2974_v54  ;;  %1933 = vmatpush1.bf16.msra.mxu1 %v3055_v5  ;;  %v3099_v5 = vld [vmem:[#allocation7 + $0x26c] ss:$16 sps:$4 sm:$0xff]  }
  0xab   :  { %1934 = vmatprep.subr.bf16.mxu1 %v3063_v6 }
  0xac   :  { %1709 = vmatpush1.bf16.msra.mxu0 %v3058_v59 }
  0xad   :  { %1710 = vmatprep.subr.bf16.mxu0 %v3066_v8 }
  0xae   :  { %1935 = vmatpush1.bf16.msra.mxu1 %v3061_v7 }
  0xaf   :  { %673 = vmatmul.mubr.bf16.gmra.mrb[28].mxu0 %v2976_v61  ;;  %1936 = vmatprep.subr.bf16.mxu1 %v3069_v9 }
  0xb0   :  { %1711 = vmatpush1.bf16.msra.mxu0 %v3064_v10  ;;  %v3469_v10 = vrot.slane %v3440_v21, %v3460_v60 }
  0xb1   :  { %786 = vmatmul.mubr.bf16.gmra.mrb[28].mxu1 %v2976_v61  ;;  %1712 = vmatprep.subr.bf16.mxu0 %v3072_v12  ;;  %v3094_v12 = vld [vmem:[#allocation7 + $0x260] ss:$16 sps:$4 sm:$0xff]  }
  0xb2   :  { %1937 = vmatpush1.bf16.msra.mxu1 %v3067_v11 }
  0xb3   :  { %1938 = vmatprep.subr.bf16.mxu1 %v3075_v13  ;;  %v3097_v13 = vld [vmem:[#allocation7 + $0x268] ss:$16 sps:$4 sm:$0xff]  }
  0xb4   :  { %1713 = vmatpush1.bf16.msra.mxu0 %v3070_v14  ;;  %v3474_v14 = vrot.slane %v3440_v21, %v3462_v1  ;;  %v3103_v21 = vld [vmem:[#allocation7 + $0x288] ss:$16 sps:$4 sm:$0xff]  }
  0xb5   :  { %1795 = vmatprep.subr.bf16.mxu0 %v3078_v16 }
  0xb6   :  { %1939 = vmatpush1.bf16.msra.mxu1 %v3073_v15 }
  0xb7   :  { %2021 = vmatprep.subr.bf16.mxu1 %v3081_v17  ;;  %v3102_v17 = vld [vmem:[#allocation7 + $0x284] ss:$16 sps:$4 sm:$0xff]  }
 0x14a   :  { %v604_v25 = vpop.f32.mrb[0].mxu0 }
 0x14b   :  { %v605_v26 = vadd.f32 %v604_v25, %v3446_v23  ;;  %v606_v27 = vpop.f32.mrb[1].mxu0 }
 0x14c   :  { %v607_v28 = vadd.f32 %v606_v27, %v3450_v24  ;;  %v608_v29 = vpop.f32.mrb[2].mxu0 }
 0x14d   :  { %v609_v30 = vadd.f32 %v608_v29, %v3446_v23  ;;  %v610_v31 = vpop.f32.mrb[3].mxu0  ;;  %v796_v33 = vmax.f32 %v605_v26, 0.0  ;;  %v717_v26 = vpop.f32.mrb[0].mxu1 }
 0x14e   :  { %v611_v32 = vadd.f32 %v610_v31, %v3450_v24  ;;  %v797_v35 = vmax.f32 %v607_v28, 0.0  ;;  %v3100_v28 = vld [vmem:[#allocation7 + $0x280] ss:$16 sps:$4 sm:$0xff]   ;;  %v718_v29 = vadd.f32 %v717_v26, %v3469_v10 }
 0x14f   :  { %v800_v34 = vmax.f32 %v609_v30, 0.0  ;;  %v719_v30 = vpop.f32.mrb[1].mxu1 }
 0x150   :  { %v801_v36 = vmax.f32 %v611_v32, 0.0 }
 0x151   :  { %v860_v37 = vpack.c.bf16 %v800_v34, %v796_v33  ;;  %v3108_v33 = vld [vmem:[#allocation7 + $0x2a4] ss:$16 sps:$4 sm:$0xff]   ;;  %v720_v34 = vadd.f32 %v719_v30, %v3474_v14 }
 0x152   :  { %v861_v38 = vpack.c.bf16 %v801_v36, %v797_v35  ;;  %v614_v39 = vpop.f32.mrb[4].mxu0  ;;  %v721_v35 = vpop.f32.mrb[2].mxu1 }
 0x153   :  { %v615_v42 = vadd.f32 %v614_v39, %v3446_v23  ;;  %v616_v43 = vpop.f32.mrb[5].mxu0  ;;  %v798_v39 = vmax.f32 %v718_v29, 0.0 }
 0x154   :  { %v617_v46 = vadd.f32 %v616_v43, %v3450_v24  ;;  %v618_v47 = vpop.f32.mrb[6].mxu0  ;;  %1714 = vmatprep.mubr.bf16.mxu0 %v861_v38  ;;  %1940 = vmatprep.mubr.bf16.mxu1 %v861_v38  ;;  %v3111_v38 = vld [vmem:[#allocation7 + $0x2ac] ss:$16 sps:$4 sm:$0xff]  }
 0x155   :  { %v619_v48 = vadd.f32 %v618_v47, %v3446_v23  ;;  %v620_v49 = vpop.f32.mrb[7].mxu0  ;;  %1715 = vmatmul.mubr.bf16.vlgmr.msra.gmra.mrb[32].mxu0 %v860_v37  ;;  %1941 = vmatmul.mubr.bf16.vlgmr.msra.gmra.mrb[32].mxu1 %v860_v37  ;;  %v804_v53 = vmax.f32 %v615_v42, 0.0 }
 0x156   :  { %v621_v50 = vadd.f32 %v620_v49, %v3450_v24  ;;  %1796 = vmatpush1.bf16.msra.mxu0 %v3076_v40  ;;  %2022 = vmatpush1.bf16.msra.mxu1 %v3079_v41  ;;  %v805_v57 = vmax.f32 %v617_v46, 0.0  ;;  %v722_v40 = vadd.f32 %v721_v35, %v3469_v10  ;;  %v723_v41 = vpop.f32.mrb[3].mxu1  ;;  %v3126_v35 = vld [vmem:[#allocation7 + $0x304] ss:$16 sps:$4 sm:$0xff]  }
 0x157   :  { %v808_v54 = vmax.f32 %v619_v48, 0.0  ;;  %1797 = vmatprep.subr.bf16.mxu0 %v3084_v44  ;;  %2023 = vmatprep.subr.bf16.mxu1 %v3087_v45  ;;  %v799_v44 = vmax.f32 %v720_v34, 0.0  ;;  %v724_v45 = vadd.f32 %v723_v41, %v3474_v14 }
 0x158   :  { %v809_v58 = vmax.f32 %v621_v50, 0.0  ;;  %v802_v48 = vmax.f32 %v722_v40, 0.0  ;;  %v3106_v50 = vld [vmem:[#allocation7 + $0x2a0] ss:$16 sps:$4 sm:$0xff]  }
 0x159   :  { %v864_v59 = vpack.c.bf16 %v808_v54, %v804_v53 }
 0x15a   :  { %v865_v61 = vpack.c.bf16 %v809_v58, %v805_v57  ;;  %1798 = vmatpush1.bf16.msra.mxu0 %v3082_v51  ;;  %v624_v62 = vpop.f32.mrb[8].mxu0  ;;  %2024 = vmatpush1.bf16.msra.mxu1 %v3085_v52  ;;  %v3109_v51 = vld [vmem:[#allocation7 + $0x2a8] ss:$16 sps:$4 sm:$0xff]   ;;  %v803_v52 = vmax.f32 %v724_v45, 0.0  ;;  %v3484_v57 = vpack.c.bf16 %v802_v48, %v798_v39 }
 0x15b   :  { %v625_v2 = vadd.f32 %v624_v62, %v3446_v23  ;;  %v626_v3 = vpop.f32.mrb[9].mxu0  ;;  %1799 = vmatprep.subr.bf16.mxu0 %v3090_v55  ;;  %2025 = vmatprep.subr.bf16.mxu1 %v3093_v56  ;;  %v3114_v55 = vld [vmem:[#allocation7 + $0x2c4] ss:$16 sps:$4 sm:$0xff]   ;;  %v3117_v56 = vld [vmem:[#allocation7 + $0x2cc] ss:$16 sps:$4 sm:$0xff]   ;;  %v727_v62 = vpop.f32.mrb[4].mxu1 }
 0x15c   :  { %v627_v6 = vadd.f32 %v626_v3, %v3450_v24  ;;  %v628_v7 = vpop.f32.mrb[10].mxu0  ;;  %1724 = vmatprep.mubr.bf16.mxu0 %v865_v61  ;;  %1950 = vmatprep.mubr.bf16.mxu1 %v865_v61  ;;  %v3486_v61 = vpack.c.bf16 %v803_v52, %v799_v44  ;;  %v729_v3 = vpop.f32.mrb[5].mxu1  ;;  %v3127_v48 = vld [vmem:[#allocation7 + $0x308] ss:$16 sps:$4 sm:$0xff]  }
 0x15d   :  { %v629_v8 = vadd.f32 %v628_v7, %v3446_v23  ;;  %v630_v9 = vpop.f32.mrb[11].mxu0  ;;  %1725 = vmatmul.mubr.bf16.gmra.mrb[36].mxu0 %v864_v59  ;;  %1951 = vmatmul.mubr.bf16.gmra.mrb[36].mxu1 %v864_v59  ;;  %v812_v15 = vmax.f32 %v625_v2, 0.0  ;;  %v728_v2 = vadd.f32 %v727_v62, %v3469_v10  ;;  %v3120_v7 = vld [vmem:[#allocation7 + $0x2e4] ss:$16 sps:$4 sm:$0xff]  }
 0x15e   :  { %v631_v11 = vadd.f32 %v630_v9, %v3450_v24  ;;  %1800 = vmatpush1.bf16.msra.mxu0 %v3088_v63  ;;  %2026 = vmatpush1.bf16.msra.mxu1 %v3091_v0  ;;  %v813_v19 = vmax.f32 %v627_v6, 0.0  ;;  %v3112_v0 = vld [vmem:[#allocation7 + $0x2c0] ss:$16 sps:$4 sm:$0xff]   ;;  %v3115_v6 = vld [vmem:[#allocation7 + $0x2c8] ss:$16 sps:$4 sm:$0xff]   ;;  %v731_v9 = vpop.f32.mrb[6].mxu1 }
 0x15f   :  { %v816_v16 = vmax.f32 %v629_v8, 0.0  ;;  %1801 = vmatprep.subr.bf16.mxu0 %v3096_v4  ;;  %2027 = vmatprep.subr.bf16.mxu1 %v3099_v5  ;;  %v730_v8 = vadd.f32 %v729_v3, %v3474_v14 }
 0x160   :  { %v817_v25 = vmax.f32 %v631_v11, 0.0 }
 0x161   :  { %v868_v27 = vpack.c.bf16 %v816_v16, %v812_v15  ;;  %v806_v15 = vmax.f32 %v728_v2, 0.0  ;;  %v732_v16 = vadd.f32 %v731_v9, %v3469_v10 }
 0x162   :  { %v869_v31 = vpack.c.bf16 %v817_v25, %v813_v19  ;;  %1802 = vmatpush1.bf16.msra.mxu0 %v3094_v12  ;;  %v634_v32 = vpop.f32.mrb[12].mxu0  ;;  %2028 = vmatpush1.bf16.msra.mxu1 %v3097_v13  ;;  %v3123_v13 = vld [vmem:[#allocation7 + $0x2ec] ss:$16 sps:$4 sm:$0xff]   ;;  %v807_v25 = vmax.f32 %v730_v8, 0.0 }
 0x163   :  { %v635_v36 = vadd.f32 %v634_v32, %v3446_v23  ;;  %v636_v37 = vpop.f32.mrb[13].mxu0  ;;  %1803 = vmatprep.subr.bf16.mxu0 %v3102_v17  ;;  %2029 = vmatprep.subr.bf16.mxu1 %v3105_v18  ;;  %v733_v17 = vpop.f32.mrb[7].mxu1  ;;  %v810_v29 = vmax.f32 %v732_v16, 0.0  ;;  %v3121_v32 = vld [vmem:[#allocation7 + $0x2e8] ss:$16 sps:$4 sm:$0xff]  }
 0x164   :  { %v637_v42 = vadd.f32 %v636_v37, %v3450_v24  ;;  %v638_v43 = vpop.f32.mrb[14].mxu0  ;;  %1734 = vmatprep.mubr.bf16.mxu0 %v869_v31  ;;  %1960 = vmatprep.mubr.bf16.mxu1 %v869_v31  ;;  %v734_v26 = vadd.f32 %v733_v17, %v3474_v14  ;;  %v3118_v31 = vld [vmem:[#allocation7 + $0x2e0] ss:$16 sps:$4 sm:$0xff]   ;;  %v737_v41 = vpop.f32.mrb[8].mxu1 }
 0x165   :  { %v639_v46 = vadd.f32 %v638_v43, %v3446_v23  ;;  %v640_v47 = vpop.f32.mrb[15].mxu0  ;;  %1735 = vmatmul.mubr.bf16.gmra.mrb[40].mxu0 %v868_v27  ;;  %1961 = vmatmul.mubr.bf16.gmra.mrb[40].mxu1 %v868_v27  ;;  %v820_v53 = vmax.f32 %v635_v36, 0.0  ;;  %v3129_v36 = vld [vmem:[#allocation7 + $0x30c] ss:$16 sps:$4 sm:$0xff]   ;;  %v3496_v37 = vpack.c.bf16 %v810_v29, %v806_v15  ;;  %v3124_v43 = vld [vmem:[#allocation7 + $0x300] ss:$16 sps:$4 sm:$0xff]   ;;  %v738_v44 = vadd.f32 %v737_v41, %v3469_v10 }
 0x166   :  { %v641_v49 = vadd.f32 %v640_v47, %v3450_v24  ;;  %1804 = vmatpush1.bf16.msra.mxu0 %v3100_v28  ;;  %2030 = vmatpush1.bf16.msra.mxu1 %v3103_v21  ;;  %v821_v58 = vmax.f32 %v637_v42, 0.0  ;;  %v811_v21 = vmax.f32 %v734_v26, 0.0  ;;  %v739_v45 = vpop.f32.mrb[9].mxu1  ;;  %v3136_v26 = vld [vmem:[#allocation7 + $0x340] ss:$16 sps:$4 sm:$0xff]  }
 0x167   :  { %v824_v54 = vmax.f32 %v639_v46, 0.0  ;;  %1805 = vmatprep.subr.bf16.mxu0 %v3108_v33  ;;  %2031 = vmatprep.subr.bf16.mxu1 %v3111_v38 }
 0x168   :  { %v825_v59 = vmax.f32 %v641_v49, 0.0  ;;  %v3498_v40 = vpack.c.bf16 %v811_v21, %v807_v25  ;;  %v3132_v49 = vld [vmem:[#allocation7 + $0x324] ss:$16 sps:$4 sm:$0xff]  }
 0x169   :  { %v872_v63 = vpack.c.bf16 %v824_v54, %v820_v53  ;;  %v3135_v54 = vld [vmem:[#allocation7 + $0x32c] ss:$16 sps:$4 sm:$0xff]  }
 0x16a   :  { %v873_v4 = vpack.c.bf16 %v825_v59, %v821_v58  ;;  %1806 = vmatpush1.bf16.msra.mxu0 %v3106_v50  ;;  %v644_v5 = vpop.f32.mrb[16].mxu0  ;;  %2032 = vmatpush1.bf16.msra.mxu1 %v3109_v51  ;;  %v740_v50 = vadd.f32 %v739_v45, %v3474_v14  ;;  %v741_v51 = vpop.f32.mrb[10].mxu1 }
 0x16b   :  { %v645_v11 = vadd.f32 %v644_v5, %v3446_v23  ;;  %v646_v12 = vpop.f32.mrb[17].mxu0  ;;  %1807 = vmatprep.subr.bf16.mxu0 %v3114_v55  ;;  %2033 = vmatprep.subr.bf16.mxu1 %v3117_v56  ;;  %v814_v55 = vmax.f32 %v738_v44, 0.0  ;;  %v742_v56 = vadd.f32 %v741_v51, %v3469_v10  ;;  %v743_v58 = vpop.f32.mrb[11].mxu1  ;;  %v3145_v51 = vld [vmem:[#allocation7 + $0x368] ss:$16 sps:$4 sm:$0xff]  }
 0x16c   :  { %v647_v18 = vadd.f32 %v646_v12, %v3450_v24  ;;  %v648_v19 = vpop.f32.mrb[18].mxu0  ;;  %1744 = vmatprep.mubr.bf16.mxu0 %v873_v4  ;;  %1970 = vmatprep.mubr.bf16.mxu1 %v873_v4  ;;  %v3138_v12 = vld [vmem:[#allocation7 + $0x344] ss:$16 sps:$4 sm:$0xff]  }
 0x16d   :  { %v649_v27 = vadd.f32 %v648_v19, %v3446_v23  ;;  %v650_v28 = vpop.f32.mrb[19].mxu0  ;;  %1745 = vmatmul.mubr.bf16.gmra.mrb[44].mxu0 %v872_v63  ;;  %1971 = vmatmul.mubr.bf16.gmra.mrb[44].mxu1 %v872_v63  ;;  %v828_v33 = vmax.f32 %v645_v11, 0.0  ;;  %v815_v63 = vmax.f32 %v740_v50, 0.0  ;;  %v818_v4 = vmax.f32 %v742_v56, 0.0  ;;  %v747_v19 = vpop.f32.mrb[12].mxu1 }
 0x16e   :  { %v651_v30 = vadd.f32 %v650_v28, %v3450_v24  ;;  %1808 = vmatpush1.bf16.msra.mxu0 %v3112_v0  ;;  %2034 = vmatpush1.bf16.msra.mxu1 %v3115_v6  ;;  %v829_v38 = vmax.f32 %v647_v18, 0.0  ;;  %v744_v0 = vadd.f32 %v743_v58, %v3474_v14  ;;  %v3130_v6 = vld [vmem:[#allocation7 + $0x320] ss:$16 sps:$4 sm:$0xff]   ;;  %v749_v28 = vpop.f32.mrb[13].mxu1  ;;  %v3153_v56 = vld [vmem:[#allocation7 + $0x38c] ss:$16 sps:$4 sm:$0xff]  }
 0x16f   :  { %v832_v34 = vmax.f32 %v649_v27, 0.0  ;;  %1809 = vmatprep.subr.bf16.mxu0 %v3120_v7  ;;  %2035 = vmatprep.subr.bf16.mxu1 %v3123_v13  ;;  %v3133_v7 = vld [vmem:[#allocation7 + $0x328] ss:$16 sps:$4 sm:$0xff]   ;;  %v3141_v13 = vld [vmem:[#allocation7 + $0x34c] ss:$16 sps:$4 sm:$0xff]   ;;  %v3508_v15 = vpack.c.bf16 %v818_v4, %v814_v55  ;;  %v748_v27 = vadd.f32 %v747_v19, %v3469_v10  ;;  %v750_v21 = vadd.f32 %v749_v28, %v3474_v14 }
 0x170   :  { %v833_v39 = vmax.f32 %v651_v30, 0.0  ;;  %v819_v8 = vmax.f32 %v744_v0, 0.0  ;;  %v3142_v50 = vld [vmem:[#allocation7 + $0x360] ss:$16 sps:$4 sm:$0xff]   ;;  %v3150_v55 = vld [vmem:[#allocation7 + $0x384] ss:$16 sps:$4 sm:$0xff]  }
 0x171   :  { %v876_v42 = vpack.c.bf16 %v832_v34, %v828_v33  ;;  %v751_v33 = vpop.f32.mrb[14].mxu1  ;;  %v823_v44 = vmax.f32 %v750_v21, 0.0 }
 0x172   :  { %v877_v46 = vpack.c.bf16 %v833_v39, %v829_v38  ;;  %1810 = vmatpush1.bf16.msra.mxu0 %v3118_v31  ;;  %v654_v47 = vpop.f32.mrb[20].mxu0  ;;  %2036 = vmatpush1.bf16.msra.mxu1 %v3121_v32  ;;  %v3510_v18 = vpack.c.bf16 %v819_v8, %v815_v63  ;;  %v3139_v31 = vld [vmem:[#allocation7 + $0x348] ss:$16 sps:$4 sm:$0xff]   ;;  %v3144_v32 = vld [vmem:[#allocation7 + $0x364] ss:$16 sps:$4 sm:$0xff]   ;;  %v822_v38 = vmax.f32 %v748_v27, 0.0  ;;  %v752_v39 = vadd.f32 %v751_v33, %v3469_v10 }
 0x173   :  { %v655_v52 = vadd.f32 %v654_v47, %v3446_v23  ;;  %v656_v53 = vpop.f32.mrb[21].mxu0  ;;  %1811 = vmatprep.subr.bf16.mxu0 %v3126_v35  ;;  %2037 = vmatprep.subr.bf16.mxu1 %v3129_v36  ;;  %v3147_v36 = vld [vmem:[#allocation7 + $0x36c] ss:$16 sps:$4 sm:$0xff]   ;;  %v753_v41 = vpop.f32.mrb[15].mxu1  ;;  %v3151_v8 = vld [vmem:[#allocation7 + $0x388] ss:$16 sps:$4 sm:$0xff]  }
 0x174   :  { %v657_v59 = vadd.f32 %v656_v53, %v3450_v24  ;;  %v658_v62 = vpop.f32.mrb[22].mxu0  ;;  %1754 = vmatprep.mubr.bf16.mxu0 %v877_v46  ;;  %1980 = vmatprep.mubr.bf16.mxu1 %v877_v46  ;;  %v754_v45 = vadd.f32 %v753_v41, %v3474_v14  ;;  %v757_v0 = vpop.f32.mrb[16].mxu1  ;;  %v3162_v41 = vld [vmem:[#allocation7 + $0x3c4] ss:$16 sps:$4 sm:$0xff]  }
 0x175   :  { %v659_v2 = vadd.f32 %v658_v62, %v3446_v23  ;;  %v660_v3 = vpop.f32.mrb[23].mxu0  ;;  %1755 = vmatmul.mubr.bf16.gmra.mrb[48].mxu0 %v876_v42  ;;  %1981 = vmatmul.mubr.bf16.gmra.mrb[48].mxu1 %v876_v42  ;;  %v836_v9 = vmax.f32 %v655_v52, 0.0  ;;  %v758_v4 = vadd.f32 %v757_v0, %v3469_v10 }
 0x176   :  { %v661_v5 = vadd.f32 %v660_v3, %v3450_v24  ;;  %1812 = vmatpush1.bf16.msra.mxu0 %v3124_v43  ;;  %2038 = vmatpush1.bf16.msra.mxu1 %v3127_v48  ;;  %v837_v16 = vmax.f32 %v657_v59, 0.0  ;;  %v826_v48 = vmax.f32 %v752_v39, 0.0  ;;  %v827_v52 = vmax.f32 %v754_v45, 0.0  ;;  %v3148_v3 = vld [vmem:[#allocation7 + $0x380] ss:$16 sps:$4 sm:$0xff]  }
 0x177   :  { %v840_v11 = vmax.f32 %v659_v2, 0.0  ;;  %1813 = vmatprep.subr.bf16.mxu0 %v3132_v49  ;;  %2039 = vmatprep.subr.bf16.mxu1 %v3135_v54  ;;  %v830_v19 = vmax.f32 %v758_v4, 0.0  ;;  %v3166_v4 = vld [vmem:[#allocation7 + $0x3e0] ss:$16 sps:$4 sm:$0xff]  }
 0x178   :  { %v841_v17 = vmax.f32 %v661_v5, 0.0  ;;  %v3520_v58 = vpack.c.bf16 %v826_v48, %v822_v38  ;;  %v3522_v63 = vpack.c.bf16 %v827_v52, %v823_v44  ;;  %v759_v5 = vpop.f32.mrb[17].mxu1 }
 0x179   :  { %v880_v25 = vpack.c.bf16 %v840_v11, %v836_v9  ;;  %v3156_v9 = vld [vmem:[#allocation7 + $0x3a4] ss:$16 sps:$4 sm:$0xff]   ;;  %v760_v11 = vadd.f32 %v759_v5, %v3474_v14  ;;  %v3169_v5 = vld [vmem:[#allocation7 + $0x3e8] ss:$16 sps:$4 sm:$0xff]  }
 0x17a   :  { %v881_v29 = vpack.c.bf16 %v841_v17, %v837_v16  ;;  %1814 = vmatpush1.bf16.msra.mxu0 %v3130_v6  ;;  %v664_v30 = vpop.f32.mrb[24].mxu0  ;;  %2040 = vmatpush1.bf16.msra.mxu1 %v3133_v7  ;;  %v3159_v17 = vld [vmem:[#allocation7 + $0x3ac] ss:$16 sps:$4 sm:$0xff]  }
 0x17b   :  { %v665_v34 = vadd.f32 %v664_v30, %v3446_v23  ;;  %v666_v35 = vpop.f32.mrb[25].mxu0  ;;  %1815 = vmatprep.subr.bf16.mxu0 %v3138_v12  ;;  %2041 = vmatprep.subr.bf16.mxu1 %v3141_v13  ;;  %v761_v12 = vpop.f32.mrb[18].mxu1 }
 0x17c   :  { %v667_v42 = vadd.f32 %v666_v35, %v3450_v24  ;;  %v668_v43 = vpop.f32.mrb[26].mxu0  ;;  %1764 = vmatprep.mubr.bf16.mxu0 %v881_v29  ;;  %1990 = vmatprep.mubr.bf16.mxu1 %v881_v29  ;;  %v831_v29 = vmax.f32 %v760_v11, 0.0  ;;  %v3157_v35 = vld [vmem:[#allocation7 + $0x3a8] ss:$16 sps:$4 sm:$0xff]  }
 0x17d   :  { %v669_v46 = vadd.f32 %v668_v43, %v3446_v23  ;;  %v670_v47 = vpop.f32.mrb[27].mxu0  ;;  %1765 = vmatmul.mubr.bf16.gmra.mrb[52].mxu0 %v880_v25  ;;  %1991 = vmatmul.mubr.bf16.gmra.mrb[52].mxu1 %v880_v25  ;;  %v844_v53 = vmax.f32 %v665_v34, 0.0  ;;  %v762_v25 = vadd.f32 %v761_v12, %v3469_v10  ;;  %v3154_v34 = vld [vmem:[#allocation7 + $0x3a0] ss:$16 sps:$4 sm:$0xff]  }
 0x17e   :  { %v671_v49 = vadd.f32 %v670_v47, %v3450_v24  ;;  %1816 = vmatpush1.bf16.msra.mxu0 %v3136_v26  ;;  %2042 = vmatpush1.bf16.msra.mxu1 %v3139_v31  ;;  %v845_v59 = vmax.f32 %v667_v42, 0.0  ;;  %v763_v26 = vpop.f32.mrb[19].mxu1  ;;  %v3165_v42 = vld [vmem:[#allocation7 + $0x3cc] ss:$16 sps:$4 sm:$0xff]  }
 0x17f   :  { %v848_v54 = vmax.f32 %v669_v46, 0.0  ;;  %1817 = vmatprep.subr.bf16.mxu0 %v3144_v32  ;;  %2043 = vmatprep.subr.bf16.mxu1 %v3147_v36  ;;  %v764_v30 = vadd.f32 %v763_v26, %v3474_v14  ;;  %v834_v21 = vmax.f32 %v762_v25, 0.0  ;;  %v767_v46 = vpop.f32.mrb[20].mxu1 }
 0x180   :  { %v849_v62 = vmax.f32 %v671_v49, 0.0  ;;  %v769_v48 = vpop.f32.mrb[21].mxu1 }
 0x181   :  { %v884_v2 = vpack.c.bf16 %v848_v54, %v844_v53  ;;  %v835_v36 = vmax.f32 %v764_v30, 0.0  ;;  %v3532_v43 = vpack.c.bf16 %v834_v21, %v830_v19  ;;  %v770_v52 = vadd.f32 %v769_v48, %v3474_v14  ;;  %v771_v53 = vpop.f32.mrb[22].mxu1  ;;  %v3168_v54 = vld [vmem:[#allocation7 + $0x3e4] ss:$16 sps:$4 sm:$0xff]  }
 0x182   :  { %v885_v6 = vpack.c.bf16 %v849_v62, %v845_v59  ;;  %1818 = vmatpush1.bf16.msra.mxu0 %v3142_v50  ;;  %v674_v7 = vpop.f32.mrb[28].mxu0  ;;  %2044 = vmatpush1.bf16.msra.mxu1 %v3145_v51  ;;  %v3160_v50 = vld [vmem:[#allocation7 + $0x3c0] ss:$16 sps:$4 sm:$0xff]   ;;  %v3163_v51 = vld [vmem:[#allocation7 + $0x3c8] ss:$16 sps:$4 sm:$0xff]   ;;  %v773_v59 = vpop.f32.mrb[23].mxu1 }
 0x183   :  { %v675_v13 = vadd.f32 %v674_v7, %v3446_v23  ;;  %v676_v16 = vpop.f32.mrb[29].mxu0  ;;  %1819 = vmatprep.subr.bf16.mxu0 %v3150_v55  ;;  %2045 = vmatprep.subr.bf16.mxu1 %v3153_v56  ;;  %v3534_v45 = vpack.c.bf16 %v835_v36, %v831_v29  ;;  %v772_v56 = vadd.f32 %v771_v53, %v3469_v10  ;;  %v3171_v62 = vld [vmem:[#allocation7 + $0x3ec] ss:$16 sps:$4 sm:$0xff]   ;;  %v839_v0 = vmax.f32 %v770_v52, 0.0 }
 0x184   :  { %v677_v27 = vadd.f32 %v676_v16, %v3450_v24  ;;  %v678_v28 = vpop.f32.mrb[30].mxu0  ;;  %1774 = vmatprep.mubr.bf16.mxu0 %v885_v6  ;;  %2000 = vmatprep.mubr.bf16.mxu1 %v885_v6 }
 0x185   :  { %v679_v31 = vadd.f32 %v678_v28, %v3446_v23  ;;  %v680_v32 = vpop.f32.mrb[31].mxu0  ;;  %1775 = vmatmul.mubr.bf16.gmra.mrb[56].mxu0 %v884_v2  ;;  %2001 = vmatmul.mubr.bf16.gmra.mrb[56].mxu1 %v884_v2  ;;  %v852_v38 = vmax.f32 %v675_v13, 0.0  ;;  %v774_v2 = vadd.f32 %v773_v59, %v3474_v14 }
 0x186   :  { %v681_v33 = vadd.f32 %v680_v32, %v3450_v24  ;;  %1820 = vmatpush1.bf16.msra.mxu0 %v3148_v3  ;;  %2046 = vmatpush1.bf16.msra.mxu1 %v3151_v8  ;;  %v853_v23 = vmax.f32 %v677_v27, 0.0  ;;  %v768_v24 = vadd.f32 %v767_v46, %v3469_v10  ;;  %v842_v3 = vmax.f32 %v772_v56, 0.0 }
 0x187   :  { %v856_v39 = vmax.f32 %v679_v31, 0.0  ;;  %1821 = vmatprep.subr.bf16.mxu0 %v3156_v9  ;;  %2047 = vmatprep.subr.bf16.mxu1 %v3159_v17  ;;  %v843_v6 = vmax.f32 %v774_v2, 0.0  ;;  %v777_v9 = vpop.f32.mrb[24].mxu1 }
 0x188   :  { %v857_v44 = vmax.f32 %v681_v33, 0.0  ;;  %v838_v55 = vmax.f32 %v768_v24, 0.0  ;;  %v778_v11 = vadd.f32 %v777_v9, %v3469_v10  ;;  %v779_v12 = vpop.f32.mrb[25].mxu1 }
 0x189   :  { %v888_v47 = vpack.c.bf16 %v856_v39, %v852_v38  ;;  %v883_v8 = vpack.c.bf16 %v843_v6, %v839_v0  ;;  %v780_v13 = vadd.f32 %v779_v12, %v3474_v14  ;;  %v781_v16 = vpop.f32.mrb[26].mxu1 }
 0x18a   :  { %v889_v49 = vpack.c.bf16 %v857_v44, %v853_v23  ;;  %1822 = vmatpush1.bf16.msra.mxu0 %v3154_v34  ;;  %2048 = vmatpush1.bf16.msra.mxu1 %v3157_v35  ;;  %v882_v7 = vpack.c.bf16 %v842_v3, %v838_v55  ;;  %v846_v17 = vmax.f32 %v778_v11, 0.0  ;;  %v782_v19 = vadd.f32 %v781_v16, %v3469_v10  ;;  %v783_v25 = vpop.f32.mrb[27].mxu1 }
 0x18b   :  { %1823 = vmatprep.subr.bf16.mxu0 %v3162_v41  ;;  %2049 = vmatprep.subr.bf16.mxu1 %v3165_v42  ;;  %v847_v26 = vmax.f32 %v780_v13, 0.0  ;;  %v784_v27 = vadd.f32 %v783_v25, %v3474_v14  ;;  %v787_v31 = vpop.f32.mrb[28].mxu1 }
 0x18c   :  { %1784 = vmatprep.mubr.bf16.mxu0 %v889_v49  ;;  %2010 = vmatprep.mubr.bf16.mxu1 %v889_v49  ;;  %v788_v32 = vadd.f32 %v787_v31, %v3469_v10  ;;  %v789_v21 = vpop.f32.mrb[29].mxu1 }
 0x18d   :  { %1785 = vmatmul.mubr.bf16.gmra.mrb[60].mxu0 %v888_v47  ;;  %2011 = vmatmul.mubr.bf16.gmra.mrb[60].mxu1 %v888_v47  ;;  %v851_v28 = vmax.f32 %v784_v27, 0.0  ;;  %v790_v33 = vadd.f32 %v789_v21, %v3474_v14  ;;  %v791_v34 = vpop.f32.mrb[30].mxu1 }
 0x18e   :  { %1824 = vmatpush1.bf16.msra.mxu0 %v3160_v50  ;;  %2050 = vmatpush1.bf16.msra.mxu1 %v3163_v51  ;;  %v854_v35 = vmax.f32 %v788_v32, 0.0  ;;  %v792_v36 = vadd.f32 %v791_v34, %v3469_v10  ;;  %v793_v38 = vpop.f32.mrb[31].mxu1  ;;  %v1020_v10 = vld [vmem:[%s3815_s4] sm:$0xf] }
 0x18f   :  { %1825 = vmatprep.subr.bf16.mxu0 %v3168_v54  ;;  %1827 = vmatprep.mubr.bf16.mxu0 %v3486_v61  ;;  %v887_v30 = vpack.c.bf16 %v851_v28, %v847_v26  ;;  %v794_v39 = vadd.f32 %v793_v38, %v3474_v14  ;;  %v3572_v14 = vrot.slane %v1020_v10, %v3435_v20 }
 0x190   :  { %2051 = vmatprep.subr.bf16.mxu1 %v3171_v62  ;;  %2053 = vmatprep.mubr.bf16.mxu1 %v3486_v61  ;;  %v850_v61 = vmax.f32 %v782_v19, 0.0 }
 0x191   :  { %v859_v41 = vmax.f32 %v794_v39, 0.0 }
 0x192   :  { %1826 = vmatpush1.bf16.msra.mxu0 %v3166_v4  ;;  %2052 = vmatpush1.bf16.msra.mxu1 %v3169_v5  ;;  %v886_v29 = vpack.c.bf16 %v850_v61, %v846_v17 }
 0x195   :  { %1828 = vmatmul.mubr.bf16.vlgmr.msra.gmra.mrb[32].mxu0 %v3484_v57  ;;  %2054 = vmatmul.mubr.bf16.vlgmr.msra.gmra.mrb[32].mxu1 %v3484_v57  ;;  %v855_v57 = vmax.f32 %v790_v33, 0.0 }
 0x196   :  { %1837 = vmatprep.mubr.bf16.mxu0 %v3498_v40  ;;  %2063 = vmatprep.mubr.bf16.mxu1 %v3498_v40  ;;  %v858_v40 = vmax.f32 %v792_v36, 0.0 }
 0x197   :  { %v891_v23 = vpack.c.bf16 %v859_v41, %v855_v57 }
 0x198   :  { %v890_v42 = vpack.c.bf16 %v858_v40, %v854_v35 }
 0x19d   :  { %1838 = vmatmul.mubr.bf16.gmra.mrb[36].mxu0 %v3496_v37  ;;  %2064 = vmatmul.mubr.bf16.gmra.mrb[36].mxu1 %v3496_v37  ;;  %v3575_v37 = vrot.slane %v1020_v10, %v3460_v60 }
 0x19e   :  { %1847 = vmatprep.mubr.bf16.mxu0 %v3510_v18  ;;  %2073 = vmatprep.mubr.bf16.mxu1 %v3510_v18  ;;  %v3581_v18 = vrot.slane %v1020_v10, %v3442_v22 }
 0x1a5   :  { %1848 = vmatmul.mubr.bf16.gmra.mrb[40].mxu0 %v3508_v15  ;;  %2074 = vmatmul.mubr.bf16.gmra.mrb[40].mxu1 %v3508_v15  ;;  %v2198_v15 = vld [vmem:[%s3816_s5] sm:$0xf] }
 0x1a6   :  { %1857 = vmatprep.mubr.bf16.mxu0 %v3522_v63  ;;  %2083 = vmatprep.mubr.bf16.mxu1 %v3522_v63  ;;  %v3593_v49 = vrot.slane %v2198_v15, %v3442_v22  ;;  %v3596_v53 = vrot.slane %v2198_v15, %v3460_v60 }
 0x1ad   :  { %1858 = vmatmul.mubr.bf16.gmra.mrb[44].mxu0 %v3520_v58  ;;  %2084 = vmatmul.mubr.bf16.gmra.mrb[44].mxu1 %v3520_v58 }
 0x1ae   :  { %1867 = vmatprep.mubr.bf16.mxu0 %v3534_v45  ;;  %2093 = vmatprep.mubr.bf16.mxu1 %v3534_v45  ;;  %v3588_v45 = vrot.slane %v2198_v15, %v3435_v20 }
 0x1b5   :  { %1868 = vmatmul.mubr.bf16.gmra.mrb[48].mxu0 %v3532_v43  ;;  %2094 = vmatmul.mubr.bf16.gmra.mrb[48].mxu1 %v3532_v43  ;;  %v3584_v43 = vrot.slane %v1020_v10, %v3462_v1 }
 0x1b6   :  { %1877 = vmatprep.mubr.bf16.mxu0 %v883_v8  ;;  %2103 = vmatprep.mubr.bf16.mxu1 %v883_v8 }
 0x1bd   :  { %1878 = vmatmul.mubr.bf16.gmra.mrb[52].mxu0 %v882_v7  ;;  %2104 = vmatmul.mubr.bf16.gmra.mrb[52].mxu1 %v882_v7  ;;  %v3607_v7 = vrot.slane %v2198_v15, %v3462_v1 }
 0x1be   :  { %1887 = vmatprep.mubr.bf16.mxu0 %v887_v30  ;;  %2113 = vmatprep.mubr.bf16.mxu1 %v887_v30 }
 0x1c5   :  { %1888 = vmatmul.mubr.bf16.gmra.mrb[56].mxu0 %v886_v29  ;;  %2114 = vmatmul.mubr.bf16.gmra.mrb[56].mxu1 %v886_v29 }
 0x1c6   :  { %1897 = vmatprep.mubr.bf16.mxu0 %v891_v23  ;;  %2123 = vmatprep.mubr.bf16.mxu1 %v891_v23 }
 0x1cd   :  { %1898 = vmatmul.mubr.bf16.gmra.mrb[60].mxu0 %v890_v42  ;;  %2124 = vmatmul.mubr.bf16.gmra.mrb[60].mxu1 %v890_v42 }
 0x268   :  { %v1829_v58 = vpop.f32.mrb[32].mxu0  ;;  %v2055_v63 = vpop.f32.mrb[32].mxu1 }
 0x269   :  { %v2725_v44 = vadd.f32 %v1829_v58, %v3572_v14  ;;  %v2757_v46 = vadd.f32 %v2055_v63, %v3575_v37  ;;  %v1831_v47 = vpop.f32.mrb[33].mxu0  ;;  %v2057_v24 = vpop.f32.mrb[33].mxu1 }
 0x26a   :  { %v2726_v48 = vadd.f32 %v1831_v47, %v3581_v18  ;;  %v1833_v50 = vpop.f32.mrb[34].mxu0  ;;  %v2059_v51 = vpop.f32.mrb[34].mxu1  ;;  %v2758_v62 = vadd.f32 %v2057_v24, %v3584_v43 }
 0x26b   :  { %v2134_v52 = vmax.f32 %v2725_v44, 0.0  ;;  %v2727_v54 = vadd.f32 %v1833_v50, %v3572_v14  ;;  %v1835_v55 = vpop.f32.mrb[35].mxu0  ;;  %v2061_v20 = vpop.f32.mrb[35].mxu1  ;;  %v2136_v56 = vmax.f32 %v2757_v46, 0.0  ;;  %v2759_v3 = vadd.f32 %v2059_v51, %v3575_v37 }
 0x26c   :  { %v2135_v59 = vmax.f32 %v2726_v48, 0.0  ;;  %v2728_v0 = vadd.f32 %v1835_v55, %v3581_v18  ;;  %v2760_v6 = vadd.f32 %v2061_v20, %v3584_v43  ;;  %v2137_v9 = vmax.f32 %v2758_v62, 0.0 }
 0x26d   :  { %v2220_v2 = vmul.f32 %v3588_v45, %v2134_v52  ;;  %v2138_v22 = vmax.f32 %v2727_v54, 0.0  ;;  %v2222_v8 = vmul.f32 %v3596_v53, %v2136_v56  ;;  %v2140_v17 = vmax.f32 %v2759_v3, 0.0 }
 0x26e   :  { %v2221_v4 = vmul.f32 %v3593_v49, %v2135_v59  ;;  %v2139_v5 = vmax.f32 %v2728_v0, 0.0  ;;  %v2141_v31 = vmax.f32 %v2760_v6, 0.0  ;;  %v2223_v39 = vmul.f32 %v3607_v7, %v2137_v9 }
 0x26f   :  { %v2224_v60 = vmul.f32 %v3588_v45, %v2138_v22  ;;  %v2226_v40 = vmul.f32 %v3596_v53, %v2140_v17 }
 0x270   :  { %v2225_v11 = vmul.f32 %v3593_v49, %v2139_v5  ;;  %v1839_v12 = vpop.f32.mrb[36].mxu0  ;;  %v2065_v13 = vpop.f32.mrb[36].mxu1  ;;  %v2284_v16 = vadd.f32 %v2221_v4, %v2220_v2  ;;  %v2227_v44 = vmul.f32 %v3607_v7, %v2141_v31 }
 0x271   :  { %v2729_v19 = vadd.f32 %v1839_v12, %v3572_v14  ;;  %v2761_v25 = vadd.f32 %v2065_v13, %v3575_v37  ;;  %v1841_v26 = vpop.f32.mrb[37].mxu0  ;;  %v2067_v27 = vpop.f32.mrb[37].mxu1 }
 0x272   :  { %v2289_v61 = vadd.f32 %v2225_v11, %v2224_v60  ;;  %v2730_v28 = vadd.f32 %v1841_v26, %v3581_v18  ;;  %v1843_v1 = vpop.f32.mrb[38].mxu0  ;;  %v2069_v29 = vpop.f32.mrb[38].mxu1  ;;  %v2285_v30 = vadd.f32 %v2284_v16, %v2222_v8  ;;  %v2762_v42 = vadd.f32 %v2067_v27, %v3584_v43 }
 0x273   :  { %v2142_v32 = vmax.f32 %v2729_v19, 0.0  ;;  %v2731_v21 = vadd.f32 %v1843_v1, %v3572_v14  ;;  %v2763_v33 = vadd.f32 %v2069_v29, %v3575_v37  ;;  %v1845_v34 = vpop.f32.mrb[39].mxu0  ;;  %v2071_v35 = vpop.f32.mrb[39].mxu1  ;;  %v2144_v36 = vmax.f32 %v2761_v25, 0.0 }
 0x274   :  { %v2143_v38 = vmax.f32 %v2730_v28, 0.0  ;;  %v2732_v57 = vadd.f32 %v1845_v34, %v3581_v18  ;;  %v2764_v58 = vadd.f32 %v2071_v35, %v3584_v43  ;;  %v2286_v63 = vadd.f32 %v2285_v30, %v2223_v39 }
 0x275   :  { %v2228_v41 = vmul.f32 %v3588_v45, %v2142_v32  ;;  %v2146_v23 = vmax.f32 %v2731_v21, 0.0  ;;  %v2148_v47 = vmax.f32 %v2763_v33, 0.0  ;;  %v2290_v24 = vadd.f32 %v2289_v61, %v2226_v40 }
 0x276   :  { %v2229_v10 = vmul.f32 %v3593_v49, %v2143_v38  ;;  %v2147_v15 = vmax.f32 %v2732_v57, 0.0  ;;  %v2230_v48 = vmul.f32 %v3596_v53, %v2144_v36  ;;  %2287 = vadd.xlane.f32.xlu0 %v2286_v63  ;;  %v2145_v55 = vmax.f32 %v2762_v42, 0.0 }
 0x277   :  { %v2232_v46 = vmul.f32 %v3588_v45, %v2146_v23  ;;  %v2291_v0 = vadd.f32 %v2290_v24, %v2227_v44  ;;  %v2149_v22 = vmax.f32 %v2764_v58, 0.0  ;;  %v2234_v6 = vmul.f32 %v3596_v53, %v2148_v47 }
 0x278   :  { %v2233_v50 = vmul.f32 %v3593_v49, %v2147_v15  ;;  %v1849_v51 = vpop.f32.mrb[40].mxu0  ;;  %v2075_v52 = vpop.f32.mrb[40].mxu1  ;;  %v2294_v54 = vadd.f32 %v2229_v10, %v2228_v41  ;;  %v2231_v28 = vmul.f32 %v3607_v7, %v2145_v55 }
 0x279   :  { %v2733_v20 = vadd.f32 %v1849_v51, %v3572_v14  ;;  %v2765_v56 = vadd.f32 %v2075_v52, %v3575_v37  ;;  %v1851_v59 = vpop.f32.mrb[41].mxu0  ;;  %v2077_v62 = vpop.f32.mrb[41].mxu1  ;;  %v2235_v1 = vmul.f32 %v3607_v7, %v2149_v22 }
 0x27a   :  { %v2299_v2 = vadd.f32 %v2233_v50, %v2232_v46  ;;  %v2734_v3 = vadd.f32 %v1851_v59, %v3581_v18  ;;  %v1853_v4 = vpop.f32.mrb[42].mxu0  ;;  %v2079_v5 = vpop.f32.mrb[42].mxu1  ;;  %v2295_v60 = vadd.f32 %v2294_v54, %v2230_v48  ;;  %v2766_v9 = vadd.f32 %v2077_v62, %v3584_v43  ;;  %2292 = vadd.xlane.f32.xlu0 %v2291_v0 }
 0x27b   :  { %v2150_v8 = vmax.f32 %v2733_v20, 0.0  ;;  %v2735_v11 = vadd.f32 %v1853_v4, %v3572_v14  ;;  %v1855_v12 = vpop.f32.mrb[43].mxu0  ;;  %v2081_v13 = vpop.f32.mrb[43].mxu1  ;;  %v2152_v16 = vmax.f32 %v2765_v56, 0.0  ;;  %v2767_v19 = vadd.f32 %v2079_v5, %v3575_v37 }
 0x27c   :  { %v2151_v17 = vmax.f32 %v2734_v3, 0.0  ;;  %v2736_v25 = vadd.f32 %v1855_v12, %v3581_v18  ;;  %v2768_v61 = vadd.f32 %v2081_v13, %v3584_v43  ;;  %v2153_v31 = vmax.f32 %v2766_v9, 0.0 }
 0x27d   :  { %v2236_v26 = vmul.f32 %v3588_v45, %v2150_v8  ;;  %v2154_v27 = vmax.f32 %v2735_v11, 0.0  ;;  %v2296_v21 = vadd.f32 %v2295_v60, %v2231_v28  ;;  %v2300_v33 = vadd.f32 %v2299_v2, %v2234_v6 }
 0x27e   :  { %v2237_v29 = vmul.f32 %v3593_v49, %v2151_v17  ;;  %v2155_v30 = vmax.f32 %v2736_v25, 0.0  ;;  %v2238_v34 = vmul.f32 %v3596_v53, %v2152_v16  ;;  %v2156_v36 = vmax.f32 %v2767_v19, 0.0 }
 0x27f   :  { %v2240_v32 = vmul.f32 %v3588_v45, %v2154_v27  ;;  %v2157_v40 = vmax.f32 %v2768_v61, 0.0  ;;  %2297 = vadd.xlane.f32.xlu1 %v2296_v21  ;;  %v2301_v15 = vadd.f32 %v2300_v33, %v2235_v1  ;;  %v2239_v54 = vmul.f32 %v3607_v7, %v2153_v31 }
 0x280   :  { %v2304_v35 = vadd.f32 %v2237_v29, %v2236_v26  ;;  %v2241_v38 = vmul.f32 %v3593_v49, %v2155_v30  ;;  %v1859_v57 = vpop.f32.mrb[44].mxu0  ;;  %v2085_v39 = vpop.f32.mrb[44].mxu1  ;;  %v2242_v59 = vmul.f32 %v3596_v53, %v2156_v36 }
 0x281   :  { %v2737_v41 = vadd.f32 %v1859_v57, %v3572_v14  ;;  %v2769_v42 = vadd.f32 %v2085_v39, %v3575_v37  ;;  %v1861_v23 = vpop.f32.mrb[45].mxu0  ;;  %v2087_v10 = vpop.f32.mrb[45].mxu1  ;;  %v2243_v22 = vmul.f32 %v3607_v7, %v2157_v40 }
 0x282   :  { %v2309_v58 = vadd.f32 %v2241_v38, %v2240_v32  ;;  %v2738_v63 = vadd.f32 %v1861_v23, %v3581_v18  ;;  %v2770_v44 = vadd.f32 %v2087_v10, %v3584_v43  ;;  %v1863_v46 = vpop.f32.mrb[46].mxu0  ;;  %v2089_v47 = vpop.f32.mrb[46].mxu1  ;;  %v2305_v24 = vadd.f32 %v2304_v35, %v2238_v34 }
 0x283   :  { %v2158_v48 = vmax.f32 %v2737_v41, 0.0  ;;  %v2739_v50 = vadd.f32 %v1863_v46, %v3572_v14  ;;  %v1865_v51 = vpop.f32.mrb[47].mxu0  ;;  %v2091_v52 = vpop.f32.mrb[47].mxu1  ;;  %v2160_v55 = vmax.f32 %v2769_v42, 0.0  ;;  %v2771_v2 = vadd.f32 %v2089_v47, %v3575_v37  ;;  %2302 = vadd.xlane.f32.xlu1 %v2301_v15 }
 0x284   :  { %v2159_v20 = vmax.f32 %v2738_v63, 0.0  ;;  %v2740_v56 = vadd.f32 %v1865_v51, %v3581_v18  ;;  %v2161_v4 = vmax.f32 %v2770_v44, 0.0  ;;  %v2772_v6 = vadd.f32 %v2091_v52, %v3584_v43 }
 0x285   :  { %v2244_v62 = vmul.f32 %v3588_v45, %v2158_v48  ;;  %v2162_v0 = vmax.f32 %v2739_v50, 0.0  ;;  %v2306_v8 = vadd.f32 %v2305_v24, %v2239_v54  ;;  %v2310_v9 = vadd.f32 %v2309_v58, %v2242_v59 }
 0x286   :  { %v2245_v3 = vmul.f32 %v3593_v49, %v2159_v20  ;;  %v2163_v5 = vmax.f32 %v2740_v56, 0.0  ;;  %v2246_v11 = vmul.f32 %v3596_v53, %v2160_v55  ;;  %v2164_v19 = vmax.f32 %v2771_v2, 0.0 }
 0x287   :  { %v2248_v60 = vmul.f32 %v3588_v45, %v2162_v0  ;;  %2307 = vadd.xlane.f32.xlu0 %v2306_v8  ;;  %v2311_v27 = vadd.f32 %v2310_v9, %v2243_v22  ;;  %v2247_v21 = vmul.f32 %v3607_v7, %v2161_v4  ;;  %v2165_v33 = vmax.f32 %v2772_v6, 0.0 }
 0x288   :  { %v2314_v12 = vadd.f32 %v2245_v3, %v2244_v62  ;;  %v2249_v13 = vmul.f32 %v3593_v49, %v2163_v5  ;;  %v1869_v16 = vpop.f32.mrb[48].mxu0  ;;  %v2095_v17 = vpop.f32.mrb[48].mxu1  ;;  %v2250_v42 = vmul.f32 %v3596_v53, %v2164_v19 }
 0x289   :  { %v2741_v25 = vadd.f32 %v1869_v16, %v3572_v14  ;;  %v2773_v26 = vadd.f32 %v2095_v17, %v3575_v37  ;;  %v1871_v61 = vpop.f32.mrb[49].mxu0  ;;  %v2097_v28 = vpop.f32.mrb[49].mxu1  ;;  %2312 = vadd.xlane.f32.xlu1 %v2311_v27  ;;  %v2251_v46 = vmul.f32 %v3607_v7, %v2165_v33 }
 0x28a   :  { %v2319_v1 = vadd.f32 %v2249_v13, %v2248_v60  ;;  %v2742_v29 = vadd.f32 %v1871_v61, %v3581_v18  ;;  %v1873_v30 = vpop.f32.mrb[50].mxu0  ;;  %v2099_v31 = vpop.f32.mrb[50].mxu1  ;;  %v2315_v32 = vadd.f32 %v2314_v12, %v2246_v11  ;;  %v2774_v40 = vadd.f32 %v2097_v28, %v3584_v43 }
 0x28b   :  { %v2166_v34 = vmax.f32 %v2741_v25, 0.0  ;;  %v2743_v35 = vadd.f32 %v1873_v30, %v3572_v14  ;;  %v1875_v36 = vpop.f32.mrb[51].mxu0  ;;  %v2101_v38 = vpop.f32.mrb[51].mxu1  ;;  %v2168_v57 = vmax.f32 %v2773_v26, 0.0  ;;  %v2775_v15 = vadd.f32 %v2099_v31, %v3575_v37 }
 0x28c   :  { %v2167_v39 = vmax.f32 %v2742_v29, 0.0  ;;  %v2744_v41 = vadd.f32 %v1875_v36, %v3581_v18  ;;  %v2776_v44 = vadd.f32 %v2101_v38, %v3584_v43  ;;  %v2316_v24 = vadd.f32 %v2315_v32, %v2247_v21 }
 0x28d   :  { %v2252_v23 = vmul.f32 %v3588_v45, %v2166_v34  ;;  %v2170_v10 = vmax.f32 %v2743_v35, 0.0  ;;  %v2320_v48 = vadd.f32 %v2319_v1, %v2250_v42  ;;  %v2254_v50 = vmul.f32 %v3596_v53, %v2168_v57 }
 0x28e   :  { %v2253_v58 = vmul.f32 %v3593_v49, %v2167_v39  ;;  %v2171_v63 = vmax.f32 %v2744_v41, 0.0  ;;  %v2169_v52 = vmax.f32 %v2774_v40, 0.0  ;;  %v2172_v56 = vmax.f32 %v2775_v15, 0.0  ;;  %2317 = vadd.xlane.f32.xlu0 %v2316_v24 }
 0x28f   :  { %v2256_v47 = vmul.f32 %v3588_v45, %v2170_v10  ;;  %v2321_v0 = vadd.f32 %v2320_v48, %v2251_v46  ;;  %v2173_v4 = vmax.f32 %v2776_v44, 0.0 }
 0x290   :  { %v2324_v51 = vadd.f32 %v2253_v58, %v2252_v23  ;;  %v2257_v54 = vmul.f32 %v3593_v49, %v2171_v63  ;;  %v1879_v55 = vpop.f32.mrb[52].mxu0  ;;  %v2105_v20 = vpop.f32.mrb[52].mxu1  ;;  %v2255_v17 = vmul.f32 %v3607_v7, %v2169_v52  ;;  %v2258_v27 = vmul.f32 %v3596_v53, %v2172_v56 }
 0x291   :  { %v2745_v59 = vadd.f32 %v1879_v55, %v3572_v14  ;;  %v2777_v62 = vadd.f32 %v2105_v20, %v3575_v37  ;;  %v1881_v2 = vpop.f32.mrb[53].mxu0  ;;  %v2107_v22 = vpop.f32.mrb[53].mxu1  ;;  %2322 = vadd.xlane.f32.xlu1 %v2321_v0  ;;  %v2259_v29 = vmul.f32 %v3607_v7, %v2173_v4 }
 0x292   :  { %v2329_v3 = vadd.f32 %v2257_v54, %v2256_v47  ;;  %v2746_v5 = vadd.f32 %v1881_v2, %v3581_v18  ;;  %v1883_v60 = vpop.f32.mrb[54].mxu0  ;;  %v2109_v6 = vpop.f32.mrb[54].mxu1  ;;  %v2325_v8 = vadd.f32 %v2324_v51, %v2254_v50  ;;  %v2778_v11 = vadd.f32 %v2107_v22, %v3584_v43 }
 0x293   :  { %v2174_v9 = vmax.f32 %v2745_v59, 0.0  ;;  %v2747_v12 = vadd.f32 %v1883_v60, %v3572_v14  ;;  %v1885_v13 = vpop.f32.mrb[55].mxu0  ;;  %v2111_v16 = vpop.f32.mrb[55].mxu1  ;;  %v2176_v19 = vmax.f32 %v2777_v62, 0.0  ;;  %v2779_v1 = vadd.f32 %v2109_v6, %v3575_v37 }
 0x294   :  { %v2175_v25 = vmax.f32 %v2746_v5, 0.0  ;;  %v2748_v26 = vadd.f32 %v1885_v13, %v3581_v18  ;;  %v2780_v32 = vadd.f32 %v2111_v16, %v3584_v43  ;;  %v2177_v21 = vmax.f32 %v2778_v11, 0.0 }
 0x295   :  { %v2260_v61 = vmul.f32 %v3588_v45, %v2174_v9  ;;  %v2178_v28 = vmax.f32 %v2747_v12, 0.0  ;;  %v2326_v34 = vadd.f32 %v2325_v8, %v2255_v17  ;;  %v2330_v35 = vadd.f32 %v2329_v3, %v2258_v27 }
 0x296   :  { %v2261_v30 = vmul.f32 %v3593_v49, %v2175_v25  ;;  %v2179_v31 = vmax.f32 %v2748_v26, 0.0  ;;  %v2262_v36 = vmul.f32 %v3596_v53, %v2176_v19  ;;  %v2180_v41 = vmax.f32 %v2779_v1, 0.0 }
 0x297   :  { %v2264_v33 = vmul.f32 %v3588_v45, %v2178_v28  ;;  %2327 = vadd.xlane.f32.xlu0 %v2326_v34  ;;  %v2331_v10 = vadd.f32 %v2330_v35, %v2259_v29  ;;  %v2181_v44 = vmax.f32 %v2780_v32, 0.0  ;;  %v2263_v50 = vmul.f32 %v3607_v7, %v2177_v21 }
 0x298   :  { %v2334_v38 = vadd.f32 %v2261_v30, %v2260_v61  ;;  %v2265_v57 = vmul.f32 %v3593_v49, %v2179_v31  ;;  %v1889_v39 = vpop.f32.mrb[56].mxu0  ;;  %v2115_v40 = vpop.f32.mrb[56].mxu1  ;;  %v2266_v0 = vmul.f32 %v3596_v53, %v2180_v41 }
 0x299   :  { %v2749_v42 = vadd.f32 %v1889_v39, %v3572_v14  ;;  %v2781_v23 = vadd.f32 %v2115_v40, %v3575_v37  ;;  %v1891_v15 = vpop.f32.mrb[57].mxu0  ;;  %v2117_v58 = vpop.f32.mrb[57].mxu1  ;;  %2332 = vadd.xlane.f32.xlu1 %v2331_v10  ;;  %v2267_v4 = vmul.f32 %v3607_v7, %v2181_v44 }
 0x29a   :  { %v2339_v63 = vadd.f32 %v2265_v57, %v2264_v33  ;;  %v2750_v46 = vadd.f32 %v1891_v15, %v3581_v18  ;;  %v1893_v47 = vpop.f32.mrb[58].mxu0  ;;  %v2119_v24 = vpop.f32.mrb[58].mxu1  ;;  %v2335_v48 = vadd.f32 %v2334_v38, %v2262_v36  ;;  %v2782_v59 = vadd.f32 %v2117_v58, %v3584_v43 }
 0x29b   :  { %v2182_v51 = vmax.f32 %v2749_v42, 0.0  ;;  %v2751_v52 = vadd.f32 %v1893_v47, %v3572_v14  ;;  %v1895_v54 = vpop.f32.mrb[59].mxu0  ;;  %v2121_v55 = vpop.f32.mrb[59].mxu1  ;;  %v2184_v20 = vmax.f32 %v2781_v23, 0.0  ;;  %v2783_v3 = vadd.f32 %v2119_v24, %v3575_v37 }
 0x29c   :  { %v2183_v56 = vmax.f32 %v2750_v46, 0.0  ;;  %v2752_v62 = vadd.f32 %v1895_v54, %v3581_v18  ;;  %v2784_v8 = vadd.f32 %v2121_v55, %v3584_v43  ;;  %v2336_v9 = vadd.f32 %v2335_v48, %v2263_v50 }
 0x29d   :  { %v2268_v2 = vmul.f32 %v3588_v45, %v2182_v51  ;;  %v2186_v22 = vmax.f32 %v2751_v52, 0.0  ;;  %v2340_v11 = vadd.f32 %v2339_v63, %v2266_v0  ;;  %v2270_v12 = vmul.f32 %v3596_v53, %v2184_v20 }
 0x29e   :  { %v2269_v5 = vmul.f32 %v3593_v49, %v2183_v56  ;;  %v2187_v60 = vmax.f32 %v2752_v62, 0.0  ;;  %v2185_v16 = vmax.f32 %v2782_v59, 0.0  ;;  %v2188_v26 = vmax.f32 %v2783_v3, 0.0  ;;  %2337 = vadd.xlane.f32.xlu0 %v2336_v9 }
 0x29f   :  { %v2272_v6 = vmul.f32 %v3588_v45, %v2186_v22  ;;  %v2341_v28 = vadd.f32 %v2340_v11, %v2267_v4  ;;  %v2189_v35 = vmax.f32 %v2784_v8, 0.0 }
 0x2a0   :  { %v2344_v13 = vadd.f32 %v2269_v5, %v2268_v2  ;;  %v2273_v17 = vmul.f32 %v3593_v49, %v2187_v60  ;;  %v1899_v19 = vpop.f32.mrb[60].mxu0  ;;  %v2125_v25 = vpop.f32.mrb[60].mxu1  ;;  %v2271_v15 = vmul.f32 %v3607_v7, %v2185_v16  ;;  %v2274_v58 = vmul.f32 %v3596_v53, %v2188_v26 }
 0x2a1   :  { %v2753_v27 = vadd.f32 %v1899_v19, %v3572_v14  ;;  %v2785_v61 = vadd.f32 %v2125_v25, %v3575_v37  ;;  %v1901_v1 = vpop.f32.mrb[61].mxu0  ;;  %v2127_v29 = vpop.f32.mrb[61].mxu1  ;;  %2342 = vadd.xlane.f32.xlu1 %v2341_v28  ;;  %v2275_v24 = vmul.f32 %v3607_v7, %v2189_v35 }
 0x2a2   :  { %v2349_v30 = vadd.f32 %v2273_v17, %v2272_v6  ;;  %v2754_v31 = vadd.f32 %v1901_v1, %v3581_v18  ;;  %v2786_v32 = vadd.f32 %v2127_v29, %v3584_v43  ;;  %v1903_v21 = vpop.f32.mrb[62].mxu0  ;;  %v2129_v33 = vpop.f32.mrb[62].mxu1  ;;  %v2345_v34 = vadd.f32 %v2344_v13, %v2270_v12 }
 0x2a3   :  { %v2190_v36 = vmax.f32 %v2753_v27, 0.0  ;;  %v2755_v38 = vadd.f32 %v1903_v21, %v3572_v14  ;;  %v2787_v57 = vadd.f32 %v2129_v33, %v3575_v37  ;;  %v1905_v39 = vpop.f32.mrb[63].mxu0  ;;  %v2131_v40 = vpop.f32.mrb[63].mxu1  ;;  %v2192_v41 = vmax.f32 %v2785_v61, 0.0 }
 0x2a4   :  { %v2191_v42 = vmax.f32 %v2754_v31, 0.0  ;;  %v2756_v23 = vadd.f32 %v1905_v39, %v3581_v18  ;;  %v2788_v10 = vadd.f32 %v2131_v40, %v3584_v43  ;;  %v2193_v14 = vmax.f32 %v2786_v32, 0.0 }
 0x2a5   :  { %v2276_v63 = vmul.f32 %v3588_v45, %v2190_v36  ;;  %v2194_v44 = vmax.f32 %v2755_v38, 0.0  ;;  %v2196_v47 = vmax.f32 %v2787_v57, 0.0  ;;  %v2346_v50 = vadd.f32 %v2345_v34, %v2271_v15 }
 0x2a6   :  { %v2277_v46 = vmul.f32 %v3593_v49, %v2191_v42  ;;  %v2195_v37 = vmax.f32 %v2756_v23, 0.0  ;;  %v2350_v18 = vadd.f32 %v2349_v30, %v2274_v58  ;;  %v2278_v43 = vmul.f32 %v3596_v53, %v2192_v41 }
 0x2a7   :  { %v2280_v48 = vmul.f32 %v3588_v45, %v2194_v44  ;;  %v2197_v54 = vmax.f32 %v2788_v10, 0.0  ;;  %2347 = vadd.xlane.f32.xlu0 %v2346_v50  ;;  %v2279_v20 = vmul.f32 %v3607_v7, %v2193_v14  ;;  %v2282_v56 = vmul.f32 %v3596_v53, %v2196_v47 }
 0x2a8   :  { %v2354_v51 = vadd.f32 %v2277_v46, %v2276_v63  ;;  %v2281_v52 = vmul.f32 %v3593_v49, %v2195_v37  ;;  %v2351_v55 = vadd.f32 %v2350_v18, %v2275_v24  ;;  %v3729_v49 = vstv %s3817_s6 }
 0x2a9   :  { %v2283_v0 = vmul.f32 %v3607_v7, %v2197_v54 }
 0x2aa   :  { %v2359_v59 = vadd.f32 %v2281_v52, %v2280_v48  ;;  %v2355_v62 = vadd.f32 %v2354_v51, %v2278_v43  ;;  %2352 = vadd.xlane.f32.xlu1 %v2351_v55 }
 0x2ac   :  { %v2356_v45 = vadd.f32 %v2355_v62, %v2279_v20  ;;  %v2360_v2 = vadd.f32 %v2359_v59, %v2282_v56 }
 0x2ae   :  { %2357 = vadd.xlane.f32.xlu0 %v2356_v45  ;;  %v2361_v22 = vadd.f32 %v2360_v2, %v2283_v0 }
 0x2b0   :  { %2362 = vadd.xlane.f32.xlu1 %v2361_v22 }
 0x303   :  { %v2288_v3 = vpop.xlane.xlu0 %2287 }
 0x304   :  { %v2366_v4 = vadd.f32 %v3729_v49, %v2288_v3 }
 0x306   :  { %v2709_v5 = vmul.f32 -1.442695, %v2366_v4 }
 0x307   :  { %v2293_v53 = vpop.xlane.xlu0 %2292 }
 0x308   :  { %3172 = vpow2.f32 %v2709_v5  ;;  %v2367_v60 = vadd.f32 %v3729_v49, %v2293_v53 }
 0x30a   :  { %v2710_v6 = vmul.f32 -1.442695, %v2367_v60 }
 0x30c   :  { %3174 = vpow2.f32 %v2710_v6  ;;  %v2298_v7 = vpop.xlane.xlu1 %2297 }
 0x30d   :  { %v2368_v8 = vadd.f32 %v3729_v49, %v2298_v7 }
 0x30f   :  { %v2711_v9 = vmul.f32 -1.442695, %v2368_v8 }
 0x310   :  { %v2303_v11 = vpop.xlane.xlu1 %2302 }
 0x311   :  { %3176 = vpow2.f32 %v2711_v9  ;;  %v2369_v12 = vadd.f32 %v3729_v49, %v2303_v11 }
 0x312   :  { %v3173_v13 = vpop.eup %3172 }
 0x313   :  { %v2430_v16 = vadd.f32 1.0, %v3173_v13  ;;  %v2712_v17 = vmul.f32 -1.442695, %v2369_v12 }
 0x314   :  { %v2308_v19 = vpop.xlane.xlu0 %2307 }
 0x315   :  { %3178 = vrcp.f32 %v2430_v16  ;;  %v2370_v25 = vadd.f32 %v3729_v49, %v2308_v19 }
 0x316   :  { %v3175_v26 = vpop.eup %3174  ;;  %3180 = vpow2.f32 %v2712_v17  ;;  %v2313_v27 = vpop.xlane.xlu1 %2312 }
 0x317   :  { %v2431_v61 = vadd.f32 1.0, %v3175_v26  ;;  %v2713_v28 = vmul.f32 -1.442695, %v2370_v25  ;;  %v2371_v1 = vadd.f32 %v3729_v49, %v2313_v27 }
 0x319   :  { %3182 = vrcp.f32 %v2431_v61  ;;  %v2714_v29 = vmul.f32 -1.442695, %v2371_v1 }
 0x31a   :  { %3184 = vpow2.f32 %v2713_v28 }
 0x31b   :  { %v3177_v30 = vpop.eup %3176  ;;  %3186 = vpow2.f32 %v2714_v29  ;;  %v2318_v32 = vpop.xlane.xlu0 %2317 }
 0x31c   :  { %v2432_v31 = vadd.f32 1.0, %v3177_v30  ;;  %v2372_v21 = vadd.f32 %v3729_v49, %v2318_v32 }
 0x31e   :  { %3188 = vrcp.f32 %v2432_v31  ;;  %v2323_v33 = vpop.xlane.xlu1 %2322  ;;  %v2715_v35 = vmul.f32 -1.442695, %v2372_v21 }
 0x31f   :  { %v3179_v34 = vpop.eup %3178  ;;  %v2373_v36 = vadd.f32 %v3729_v49, %v2323_v33 }
 0x320   :  { %v3181_v38 = vpop.eup %3180  ;;  %2479 = vst.msk [vmem:[%s3818_s7] sm:$0xff] %vm2478_vm0, %v3179_v34  ;;  %3190 = vpow2.f32 %v2715_v35 }
 0x321   :  { %v2433_v57 = vadd.f32 1.0, %v3181_v38  ;;  %v2716_v39 = vmul.f32 -1.442695, %v2373_v36 }
 0x323   :  { %v3183_v40 = vpop.eup %3182  ;;  %3192 = vrcp.f32 %v2433_v57 }
 0x324   :  { %v3185_v41 = vpop.eup %3184  ;;  %2480 = vst.msk [vmem:[%s3818_s7 + $0x8] sm:$0xff] %vm2478_vm0, %v3183_v40  ;;  %3194 = vpow2.f32 %v2716_v39  ;;  %v2328_v42 = vpop.xlane.xlu0 %2327 }
 0x325   :  { %v3187_v23 = vpop.eup %3186  ;;  %v2434_v10 = vadd.f32 1.0, %v3185_v41  ;;  %v2374_v15 = vadd.f32 %v3729_v49, %v2328_v42 }
 0x326   :  { %v2435_v58 = vadd.f32 1.0, %v3187_v23  ;;  %v2333_v63 = vpop.xlane.xlu1 %2332 }
 0x327   :  { %3196 = vrcp.f32 %v2434_v10  ;;  %v2717_v44 = vmul.f32 -1.442695, %v2374_v15  ;;  %v2375_v46 = vadd.f32 %v3729_v49, %v2333_v63 }
 0x328   :  { %v3189_v14 = vpop.eup %3188  ;;  %3198 = vrcp.f32 %v2435_v58 }
 0x329   :  { %2481 = vst.msk [vmem:[%s3818_s7 + $0x10] sm:$0xff] %vm2478_vm0, %v3189_v14  ;;  %3200 = vpow2.f32 %v2717_v44  ;;  %v2718_v47 = vmul.f32 -1.442695, %v2375_v46 }
 0x32a   :  { %v3191_v37 = vpop.eup %3190 }
 0x32b   :  { %3202 = vpow2.f32 %v2718_v47  ;;  %v2436_v24 = vadd.f32 1.0, %v3191_v37  ;;  %v2338_v48 = vpop.xlane.xlu0 %2337 }
 0x32c   :  { %v2376_v18 = vadd.f32 %v3729_v49, %v2338_v48 }
 0x32d   :  { %v3193_v50 = vpop.eup %3192  ;;  %3204 = vrcp.f32 %v2436_v24 }
 0x32e   :  { %v3195_v43 = vpop.eup %3194  ;;  %2482 = vst.msk [vmem:[%s3818_s7 + $0x18] sm:$0xff] %vm2478_vm0, %v3193_v50  ;;  %v2343_v51 = vpop.xlane.xlu1 %2342  ;;  %v2719_v54 = vmul.f32 -1.442695, %v2376_v18 }
 0x32f   :  { %v2437_v52 = vadd.f32 1.0, %v3195_v43  ;;  %v2377_v55 = vadd.f32 %v3729_v49, %v2343_v51 }
 0x331   :  { %v3197_v20 = vpop.eup %3196  ;;  %3206 = vrcp.f32 %v2437_v52  ;;  %v2720_v56 = vmul.f32 -1.442695, %v2377_v55 }
 0x332   :  { %v3199_v59 = vpop.eup %3198  ;;  %2483 = vst.msk [vmem:[%s3818_s7 + $0x20] sm:$0xff] %vm2478_vm0, %v3197_v20  ;;  %3208 = vpow2.f32 %v2719_v54 }
 0x333   :  { %v3201_v62 = vpop.eup %3200  ;;  %2484 = vst.msk [vmem:[%s3818_s7 + $0x28] sm:$0xff] %vm2478_vm0, %v3199_v59  ;;  %3210 = vpow2.f32 %v2720_v56 }
 0x334   :  { %v2438_v0 = vadd.f32 1.0, %v3201_v62  ;;  %v2348_v45 = vpop.xlane.xlu0 %2347 }
 0x335   :  { %v3203_v2 = vpop.eup %3202  ;;  %v2378_v22 = vadd.f32 %v3729_v49, %v2348_v45 }
 0x336   :  { %3212 = vrcp.f32 %v2438_v0  ;;  %v2439_v3 = vadd.f32 1.0, %v3203_v2 }
 0x337   :  { %v2353_v4 = vpop.xlane.xlu1 %2352  ;;  %v2721_v5 = vmul.f32 -1.442695, %v2378_v22  ;;  %v3205_v60 = vpop.eup %3204 }
 0x338   :  { %v2379_v53 = vadd.f32 %v3729_v49, %v2353_v4  ;;  %3214 = vrcp.f32 %v2439_v3  ;;  %2485 = vst.msk [vmem:[%s3818_s7 + $0x30] sm:$0xff] %vm2478_vm0, %v3205_v60 }
 0x339   :  { %3216 = vpow2.f32 %v2721_v5 }
 0x33a   :  { %v2722_v6 = vmul.f32 -1.442695, %v2379_v53 }
 0x33b   :  { %v2358_v7 = vpop.xlane.xlu0 %2357  ;;  %v3207_v9 = vpop.eup %3206 }
 0x33c   :  { %v2380_v8 = vadd.f32 %v3729_v49, %v2358_v7  ;;  %3218 = vpow2.f32 %v2722_v6  ;;  %v3209_v12 = vpop.eup %3208  ;;  %2486 = vst.msk [vmem:[%s3818_s7 + $0x38] sm:$0xff] %vm2478_vm0, %v3207_v9 }
 0x33d   :  { %v2363_v11 = vpop.xlane.xlu1 %2362  ;;  %v3211_v17 = vpop.eup %3210  ;;  %v2440_v19 = vadd.f32 1.0, %v3209_v12 }
 0x33e   :  { %v2723_v13 = vmul.f32 -1.442695, %v2380_v8  ;;  %v2381_v16 = vadd.f32 %v3729_v49, %v2363_v11  ;;  %v2441_v25 = vadd.f32 1.0, %v3211_v17 }
 0x340   :  { %3220 = vpow2.f32 %v2723_v13  ;;  %v2724_v26 = vmul.f32 -1.442695, %v2381_v16  ;;  %v3213_v27 = vpop.eup %3212 }
 0x341   :  { %3222 = vrcp.f32 %v2440_v19  ;;  %2487 = vst.msk [vmem:[%s3818_s7 + $0x40] sm:$0xff] %vm2478_vm0, %v3213_v27 }
 0x342   :  { %3224 = vrcp.f32 %v2441_v25  ;;  %v3215_v61 = vpop.eup %3214 }
 0x343   :  { %3226 = vpow2.f32 %v2724_v26  ;;  %v3217_v28 = vpop.eup %3216  ;;  %2488 = vst.msk [vmem:[%s3818_s7 + $0x48] sm:$0xff] %vm2478_vm0, %v3215_v61 }
 0x344   :  { %v2442_v49 = vadd.f32 1.0, %v3217_v28 }
 0x346   :  { %v3219_v1 = vpop.eup %3218  ;;  %3228 = vrcp.f32 %v2442_v49 }
 0x347   :  { %v2443_v29 = vadd.f32 1.0, %v3219_v1 }
 0x349   :  { %3230 = vrcp.f32 %v2443_v29 }
 0x34a   :  { %v3221_v30 = vpop.eup %3220 }
 0x34b   :  { %v3223_v31 = vpop.eup %3222  ;;  %v2444_v32 = vadd.f32 1.0, %v3221_v30 }
 0x34c   :  { %v3225_v21 = vpop.eup %3224  ;;  %2489 = vst.msk [vmem:[%s3818_s7 + $0x50] sm:$0xff] %vm2478_vm0, %v3223_v31 }
 0x34d   :  { %v3227_v33 = vpop.eup %3226  ;;  %2490 = vst.msk [vmem:[%s3818_s7 + $0x58] sm:$0xff] %vm2478_vm0, %v3225_v21  ;;  %3232 = vrcp.f32 %v2444_v32 }
 0x34e   :  { %v2445_v34 = vadd.f32 1.0, %v3227_v33 }
 0x350   :  { %3234 = vrcp.f32 %v2445_v34  ;;  %v3229_v35 = vpop.eup %3228 }
 0x351   :  { %2491 = vst.msk [vmem:[%s3818_s7 + $0x60] sm:$0xff] %vm2478_vm0, %v3229_v35 }
 0x353   :  { %v3231_v36 = vpop.eup %3230 }
 0x354   :  { %2492 = vst.msk [vmem:[%s3818_s7 + $0x68] sm:$0xff] %vm2478_vm0, %v3231_v36 }
 0x357   :  { %v3233_v38 = vpop.eup %3232 }
 0x358   :  { %2493 = vst.msk [vmem:[%s3818_s7 + $0x70] sm:$0xff] %vm2478_vm0, %v3233_v38 }
 0x35a   :  { %v3235_v57 = vpop.eup %3234 }
 0x35b   :  { %2494 = vst.msk [vmem:[%s3818_s7 + $0x78] sm:$0xff] %vm2478_vm0, %v3235_v57 }
 0x35c   :  { %2499 = vsyncpa [#allocation4], 1 }
 0x35d   :  { %2500 = vsyncpa [#allocation6], 1 }

</bundles_post_ra>
